<compile_context>
chip_gen: v7x
topology: tpu7x:2x2x1
jax: 0.10.0
libtpu: 0.0.40
codegen_flags: <defaults>
</compile_context>

<pallas_src>
import functools

import jax
import jax.numpy as jnp
from jax.experimental import pallas as pl
from jax.experimental.pallas import tpu as pltpu


# ----------------------------- kernel ---------------------------------------


def _hydro_seq2seq_kernel(
    src_ref,     # (S*B, E)    encoder inputs, time-major, flattened
    rain_ref,    # (T*B, R)    rain forecasts, time-major, flattened (R == 1)
    wih_ref,     # (E+R, 4H)   [enc_wih ; dec_wih_r]
    whh_ref,     # (3H, 4H)    [enc_whh ; dec_whh ; dec_whh_eff]
    b_ref,       # (3, 4H)     [enc_b ; dec_b ; dec_b_eff]
    fc_ref,      # (H+1, O)    [fc_w ; fc_b]
    out_ref,     # (T*B, O)    outputs, time-major, flattened
    h_all_ref,   # scratch (T*B, H) decoder hidden states
    *, B, S, T, H, E, R,
):
    # ---- static parameter slices (free) -------------------------------------
    enc_wih = wih_ref[0:E, :]               # (E, 4H)
    dec_wih_r = wih_ref[E:E + R, :]         # (R, 4H)
    enc_whh = whh_ref[0:H, :]               # (H, 4H)
    dec_whh = whh_ref[H:2 * H, :]           # (H, 4H)    step 0 (no feedback)
    dec_whh_eff = whh_ref[2 * H:3 * H, :]   # (H, 4H)    steps >= 1 (folded)
    enc_b = b_ref[0:1, :]
    dec_b = b_ref[1:2, :]
    dec_b_eff = b_ref[2:3, :]
    fc_w = fc_ref[0:H, :]                   # (H, O)
    fc_b = fc_ref[H:H + 1, :]               # (1, O)

    # ---- hoisted, batched encoder input projection (one MXU op) -------------
    x_proj = (
        jnp.dot(src_ref[...], enc_wih, preferred_element_type=jnp.float32)
        + enc_b
    )                                        # (S*B, 4H), lives in vregs

    # ---- rain projection: R == 1 -> outer product on the VPU, no MXU --------
    # Steps >= 1 use the folded bias; step 0 (zero feedback input) uses the
    # plain bias and is precomputed here, off the serialized critical path.
    if R == 1:
        r_proj = rain_ref[...] * dec_wih_r + dec_b_eff        # (T*B, 4H)
        r_proj0 = rain_ref[0:B, :] * dec_wih_r + dec_b        # (B, 4H)
    else:  # generic fallback (not exercised by HydroSeq2Seq, where R == 1)
        r_all = jnp.dot(rain_ref[...], dec_wih_r,
                        preferred_element_type=jnp.float32)
        r_proj = r_all + dec_b_eff
        r_proj0 = r_all[0:B, :] + dec_b

    # ---- LSTM cell: 2 full-vreg EUP passes over the 4H gate vector ----------
    def lstm(gates, c):
        sig = jax.nn.sigmoid(gates)
        th = jnp.tanh(gates)
        i = sig[:, 0 * H:1 * H]
        f = sig[:, 1 * H:2 * H]
        g = th[:, 2 * H:3 * H]
        o = sig[:, 3 * H:4 * H]
        c_new = f * c + i * g
        h_new = o * jnp.tanh(c_new)
        return h_new, c_new

    h = jnp.zeros((B, H), jnp.float32)
    c = jnp.zeros((B, H), jnp.float32)

    # ---- encoder recurrence: one serialized matmul per step -----------------
    for t in range(S):
        gates = x_proj[t * B:(t + 1) * B, :] + jnp.dot(
            h, enc_whh, preferred_element_type=jnp.float32)
        h, c = lstm(gates, c)

    # ---- decoder step 0 (feedback input is zeros -> unfolded weights) -------
    gates = r_proj0 + jnp.dot(h, dec_whh, preferred_element_type=jnp.float32)
    h, c = lstm(gates, c)
    h_all_ref[0:B, :] = h

    # ---- decoder steps 1..T-1: one serialized matmul per step ---------------
    # d_in(t) = h(t-1) @ fc_w + fc_b is folded into dec_whh_eff / dec_b_eff.
    for t in range(1, T):
        gates = r_proj[t * B:(t + 1) * B, :] + jnp.dot(
            h, dec_whh_eff, preferred_element_type=jnp.float32)
        h, c = lstm(gates, c)
        h_all_ref[t * B:(t + 1) * B, :] = h

    # ---- output FC off the recurrence path: one matmul + one store ----------
    out_ref[...] = (
        jnp.dot(h_all_ref[...], fc_w, preferred_element_type=jnp.float32)
        + fc_b
    )


# ----------------------------- wrapper ---------------------------------------


@functools.partial(jax.jit, static_argnames=("target_len",))
def hydro_seq2seq(src, rain_forecasts, params, target_len):
    """src: (B, S, E), rain_forecasts: (B, >=target_len, R) -> (B, target_len, O)."""
    f32 = jnp.float32
    B, S, E = src.shape
    R = rain_forecasts.shape[-1]
    H = params["enc_whh"].shape[0]
    O = params["fc_w"].shape[1]
    T = target_len

    # Time-major + flattened (transpose/reshape on tiny arrays, done by XLA).
    src_flat = jnp.transpose(src, (1, 0, 2)).reshape(S * B, E).astype(f32)
    rain_flat = jnp.transpose(
        rain_forecasts[:, :T, :], (1, 0, 2)).reshape(T * B, R).astype(f32)

    # Fold the output-feedback path into the hidden recurrence (valid t >= 1).
    hi = jax.lax.Precision.HIGHEST
    dec_whh_eff = params["dec_whh"] + jnp.dot(
        params["fc_w"], params["dec_wih_x"], precision=hi)
    dec_b_eff = params["dec_b"] + jnp.dot(
        params["fc_b"], params["dec_wih_x"], precision=hi)

    # Concatenate parameters -> 6 kernel inputs (fewer tiny DMAs).
    wih_cat = jnp.concatenate(
        [params["enc_wih"], params["dec_wih_r"]], axis=0).astype(f32)   # (E+R, 4H)
    whh_cat = jnp.concatenate(
        [params["enc_whh"], params["dec_whh"], dec_whh_eff], axis=0
    ).astype(f32)                                                        # (3H, 4H)
    b_cat = jnp.concatenate(
        [params["enc_b"], params["dec_b"], dec_b_eff], axis=0).astype(f32)  # (3, 4H)
    fc_cat = jnp.concatenate(
        [params["fc_w"], params["fc_b"]], axis=0).astype(f32)           # (H+1, O)

    vmem = pl.BlockSpec(memory_space=pltpu.MemorySpace.VMEM)
    kernel = functools.partial(
        _hydro_seq2seq_kernel, B=B, S=S, T=T, H=H, E=E, R=R)

    # NOTE: no grid — total working set is < 1 MiB, far under the VMEM limit
    # on v5e/v6e (128 MiB) and v7x (64 MiB), and the recurrence is serial so
    # a multi-TensorCore split would be pure sync overhead at these sizes.
    out_flat = pl.pallas_call(
        kernel,
        out_shape=jax.ShapeDtypeStruct((T * B, O), f32),
        in_specs=[vmem] * 6,
        out_specs=vmem,
        scratch_shapes=[pltpu.VMEM((T * B, H), f32)],
    )(src_flat, rain_flat, wih_cat, whh_cat, b_cat, fc_cat)

    return jnp.transpose(out_flat.reshape(T, B, O), (1, 0, 2))  # (B, T, O)


# ------------------------ pure-JAX reference ---------------------------------


def hydro_seq2seq_ref(src, rain_forecasts, params, target_len):
    B = src.shape[0]
    H = params["enc_whh"].shape[0]

    def lstm(gates, c):
        i, f, g, o = jnp.split(gates, 4, axis=-1)
        c_new = jax.nn.sigmoid(f) * c + jax.nn.sigmoid(i) * jnp.tanh(g)
        h_new = jax.nn.sigmoid(o) * jnp.tanh(c_new)
        return h_new, c_new

    h = jnp.zeros((B, H), jnp.float32)
    c = jnp.zeros((B, H), jnp.float32)
    for t in range(src.shape[1]):
        gates = (src[:, t, :] @ params["enc_wih"] + h @ params["enc_whh"]
                 + params["enc_b"])
        h, c = lstm(gates, c)

    O = params["fc_w"].shape[1]
    d_in = jnp.zeros((B, O), jnp.float32)
    outs = []
    for t in range(target_len):
        r = rain_forecasts[:, t, :]
        gates = (d_in @ params["dec_wih_x"] + r @ params["dec_wih_r"]
                 + h @ params["dec_whh"] + params["dec_b"])
        h, c = lstm(gates, c)
        out = h @ params["fc_w"] + params["fc_b"]
        outs.append(out)
        d_in = out
    return jnp.stack(outs, axis=1)


# ----------------------------- main ------------------------------------------

if __name__ == "__main__":
    # Small shapes consistent with the module's forward pass.
    B, S, E = 2, 8, 4        # batch, encoder sequence length, encoder features
    H = 32                   # LSTM hidden size (shared by encoder/decoder)
    R = 1                    # rain-forecast features per step
    O = 4                    # decoder.output_size
    TARGET_LEN = 12          # module default target_len

    key = jax.random.PRNGKey(0)
    ks = jax.random.split(key, 12)
    scale = 0.1
    params = {
        "enc_wih":   scale * jax.random.normal(ks[0], (E, 4 * H), jnp.float32),
        "enc_whh":   scale * jax.random.normal(ks[1], (H, 4 * H), jnp.float32),
        "enc_b":     scale * jax.random.normal(ks[2], (1, 4 * H), jnp.float32),
        "dec_wih_x": scale * jax.random.normal(ks[3], (O, 4 * H), jnp.float32),
        "dec_wih_r": scale * jax.random.normal(ks[4], (R, 4 * H), jnp.float32),
        "dec_whh":   scale * jax.random.normal(ks[5], (H, 4 * H), jnp.float32),
        "dec_b":     scale * jax.random.normal(ks[6], (1, 4 * H), jnp.float32),
        "fc_w":      scale * jax.random.normal(ks[7], (H, O), jnp.float32),
        "fc_b":      scale * jax.random.normal(ks[8], (1, O), jnp.float32),
    }

    src = jax.random.normal(ks[9], (B, S, E), jnp.float32)
    rain_forecasts = jax.random.normal(ks[10], (B, TARGET_LEN, R), jnp.float32)

    out = hydro_seq2seq(src, rain_forecasts, params, TARGET_LEN)
    out = jax.block_until_ready(out)

    ref = hydro_seq2seq_ref(src, rain_forecasts, params, TARGET_LEN)

    assert out.shape == (B, TARGET_LEN, O), out.shape
    assert bool(jnp.all(jnp.isfinite(out)))
    max_err = float(jnp.max(jnp.abs(out - ref)))
    assert max_err < 2e-2, f"mismatch vs reference: {max_err}"

    print("KERNEL_OK")
</pallas_src>

<mosaic_0001>
module attributes {stable_mosaic.version = 11 : i64} {
  func.func @_hydro_seq2seq_kernel(%arg0: memref<16x4xf32, #tpu.memory_space<vmem>>, %arg1: memref<24x1xf32, #tpu.memory_space<vmem>>, %arg2: memref<5x128xf32, #tpu.memory_space<vmem>>, %arg3: memref<96x128xf32, #tpu.memory_space<vmem>>, %arg4: memref<3x128xf32, #tpu.memory_space<vmem>>, %arg5: memref<33x4xf32, #tpu.memory_space<vmem>>, %arg6: memref<24x4xf32, #tpu.memory_space<vmem>>, %arg7: memref<24x32xf32, #tpu.memory_space<vmem>>) attributes {dimension_semantics = [], scalar_prefetch = 0 : i64, scratch_operands = 1 : i64, tpu.core_type = #tpu.core_type<tc>} {
    %c0 = arith.constant 0 : index
    %c0_0 = arith.constant 0 : index
    %0 = vector.load %arg2[%c0, %c0_0] : memref<5x128xf32, #tpu.memory_space<vmem>>, vector<4x128xf32>
    %c4 = arith.constant 4 : index
    %c0_1 = arith.constant 0 : index
    %1 = vector.load %arg2[%c4, %c0_1] : memref<5x128xf32, #tpu.memory_space<vmem>>, vector<1x128xf32>
    %c0_2 = arith.constant 0 : index
    %c0_3 = arith.constant 0 : index
    %2 = vector.load %arg3[%c0_2, %c0_3] : memref<96x128xf32, #tpu.memory_space<vmem>>, vector<32x128xf32>
    %c32 = arith.constant 32 : index
    %c0_4 = arith.constant 0 : index
    %3 = vector.load %arg3[%c32, %c0_4] : memref<96x128xf32, #tpu.memory_space<vmem>>, vector<32x128xf32>
    %c64 = arith.constant 64 : index
    %c0_5 = arith.constant 0 : index
    %4 = vector.load %arg3[%c64, %c0_5] : memref<96x128xf32, #tpu.memory_space<vmem>>, vector<32x128xf32>
    %c0_6 = arith.constant 0 : index
    %c0_7 = arith.constant 0 : index
    %5 = vector.load %arg4[%c0_6, %c0_7] : memref<3x128xf32, #tpu.memory_space<vmem>>, vector<1x128xf32>
    %c1 = arith.constant 1 : index
    %c0_8 = arith.constant 0 : index
    %6 = vector.load %arg4[%c1, %c0_8] : memref<3x128xf32, #tpu.memory_space<vmem>>, vector<1x128xf32>
    %c2 = arith.constant 2 : index
    %c0_9 = arith.constant 0 : index
    %7 = vector.load %arg4[%c2, %c0_9] : memref<3x128xf32, #tpu.memory_space<vmem>>, vector<1x128xf32>
    %c0_10 = arith.constant 0 : index
    %c0_11 = arith.constant 0 : index
    %8 = vector.load %arg5[%c0_10, %c0_11] : memref<33x4xf32, #tpu.memory_space<vmem>>, vector<32x4xf32>
    %c32_12 = arith.constant 32 : index
    %c0_13 = arith.constant 0 : index
    %9 = vector.load %arg5[%c32_12, %c0_13] : memref<33x4xf32, #tpu.memory_space<vmem>>, vector<1x4xf32>
    %c0_14 = arith.constant 0 : index
    %c0_15 = arith.constant 0 : index
    %10 = vector.load %arg0[%c0_14, %c0_15] : memref<16x4xf32, #tpu.memory_space<vmem>>, vector<16x4xf32>
    %cst = arith.constant dense<0.000000e+00> : vector<16x128xf32>
    %11 = tpu.matmul %10, %0, %cst {dimension_numbers = #tpu.dot_dimension_numbers<[1], [0], [0], [1], [0, 0, 1, 1], [], []>} : vector<16x4xf32>, vector<4x128xf32>, vector<16x128xf32> -> vector<16x128xf32>
    %12 = vector.broadcast %5 : vector<1x128xf32> to vector<16x128xf32>
    %13 = arith.addf %11, %12 : vector<16x128xf32>
    %c0_16 = arith.constant 0 : index
    %c0_17 = arith.constant 0 : index
    %14 = vector.load %arg1[%c0_16, %c0_17] : memref<24x1xf32, #tpu.memory_space<vmem>>, vector<24x1xf32>
    %15 = vector.broadcast %14 : vector<24x1xf32> to vector<24x128xf32>
    %16 = vector.broadcast %1 : vector<1x128xf32> to vector<24x128xf32>
    %17 = arith.mulf %15, %16 : vector<24x128xf32>
    %18 = vector.broadcast %7 : vector<1x128xf32> to vector<24x128xf32>
    %19 = arith.addf %17, %18 : vector<24x128xf32>
    %c0_18 = arith.constant 0 : index
    %c0_19 = arith.constant 0 : index
    %20 = vector.load %arg1[%c0_18, %c0_19] : memref<24x1xf32, #tpu.memory_space<vmem>>, vector<2x1xf32>
    %21 = vector.broadcast %20 : vector<2x1xf32> to vector<2x128xf32>
    %22 = vector.broadcast %1 : vector<1x128xf32> to vector<2x128xf32>
    %23 = arith.mulf %21, %22 : vector<2x128xf32>
    %24 = vector.broadcast %6 : vector<1x128xf32> to vector<2x128xf32>
    %25 = arith.addf %23, %24 : vector<2x128xf32>
    %cst_20 = arith.constant 0.000000e+00 : f32
    %26 = vector.broadcast %cst_20 : f32 to vector<2x32xf32>
    %cst_21 = arith.constant 0.000000e+00 : f32
    %27 = vector.broadcast %cst_21 : f32 to vector<2x32xf32>
    %28 = vector.extract_strided_slice %13 {offsets = [0, 0], sizes = [2, 128], strides = [1, 1]} : vector<16x128xf32> to vector<2x128xf32>
    %cst_22 = arith.constant dense<0.000000e+00> : vector<2x128xf32>
    %29 = tpu.matmul %26, %2, %cst_22 {dimension_numbers = #tpu.dot_dimension_numbers<[1], [0], [0], [1], [0, 0, 1, 1], [], []>} : vector<2x32xf32>, vector<32x128xf32>, vector<2x128xf32> -> vector<2x128xf32>
    %30 = arith.addf %28, %29 : vector<2x128xf32>
    %31 = arith.negf %30 : vector<2x128xf32>
    %32 = math.exp %31 : vector<2x128xf32>
    %cst_23 = arith.constant 1.000000e+00 : f32
    %33 = vector.broadcast %cst_23 : f32 to vector<2x128xf32>
    %34 = arith.addf %33, %32 : vector<2x128xf32>
    %35 = arith.divf %33, %34 : vector<2x128xf32>
    %36 = math.tanh %30 : vector<2x128xf32>
    %37 = vector.extract_strided_slice %35 {offsets = [0, 0], sizes = [2, 32], strides = [1, 1]} : vector<2x128xf32> to vector<2x32xf32>
    %38 = vector.extract_strided_slice %35 {offsets = [0, 32], sizes = [2, 32], strides = [1, 1]} : vector<2x128xf32> to vector<2x32xf32>
    %39 = vector.extract_strided_slice %36 {offsets = [0, 64], sizes = [2, 32], strides = [1, 1]} : vector<2x128xf32> to vector<2x32xf32>
    %40 = vector.extract_strided_slice %35 {offsets = [0, 96], sizes = [2, 32], strides = [1, 1]} : vector<2x128xf32> to vector<2x32xf32>
    %41 = arith.mulf %38, %27 : vector<2x32xf32>
    %42 = arith.mulf %37, %39 : vector<2x32xf32>
    %43 = arith.addf %41, %42 : vector<2x32xf32>
    %44 = math.tanh %43 : vector<2x32xf32>
    %45 = arith.mulf %40, %44 : vector<2x32xf32>
    %46 = vector.extract_strided_slice %13 {offsets = [2, 0], sizes = [2, 128], strides = [1, 1]} : vector<16x128xf32> to vector<2x128xf32>
    %cst_24 = arith.constant dense<0.000000e+00> : vector<2x128xf32>
    %47 = tpu.matmul %45, %2, %cst_24 {dimension_numbers = #tpu.dot_dimension_numbers<[1], [0], [0], [1], [0, 0, 1, 1], [], []>} : vector<2x32xf32>, vector<32x128xf32>, vector<2x128xf32> -> vector<2x128xf32>
    %48 = arith.addf %46, %47 : vector<2x128xf32>
    %49 = arith.negf %48 : vector<2x128xf32>
    %50 = math.exp %49 : vector<2x128xf32>
    %cst_25 = arith.constant 1.000000e+00 : f32
    %51 = vector.broadcast %cst_25 : f32 to vector<2x128xf32>
    %52 = arith.addf %51, %50 : vector<2x128xf32>
    %53 = arith.divf %51, %52 : vector<2x128xf32>
    %54 = math.tanh %48 : vector<2x128xf32>
    %55 = vector.extract_strided_slice %53 {offsets = [0, 0], sizes = [2, 32], strides = [1, 1]} : vector<2x128xf32> to vector<2x32xf32>
    %56 = vector.extract_strided_slice %53 {offsets = [0, 32], sizes = [2, 32], strides = [1, 1]} : vector<2x128xf32> to vector<2x32xf32>
    %57 = vector.extract_strided_slice %54 {offsets = [0, 64], sizes = [2, 32], strides = [1, 1]} : vector<2x128xf32> to vector<2x32xf32>
    %58 = vector.extract_strided_slice %53 {offsets = [0, 96], sizes = [2, 32], strides = [1, 1]} : vector<2x128xf32> to vector<2x32xf32>
    %59 = arith.mulf %56, %43 : vector<2x32xf32>
    %60 = arith.mulf %55, %57 : vector<2x32xf32>
    %61 = arith.addf %59, %60 : vector<2x32xf32>
    %62 = math.tanh %61 : vector<2x32xf32>
    %63 = arith.mulf %58, %62 : vector<2x32xf32>
    %64 = vector.extract_strided_slice %13 {offsets = [4, 0], sizes = [2, 128], strides = [1, 1]} : vector<16x128xf32> to vector<2x128xf32>
    %cst_26 = arith.constant dense<0.000000e+00> : vector<2x128xf32>
    %65 = tpu.matmul %63, %2, %cst_26 {dimension_numbers = #tpu.dot_dimension_numbers<[1], [0], [0], [1], [0, 0, 1, 1], [], []>} : vector<2x32xf32>, vector<32x128xf32>, vector<2x128xf32> -> vector<2x128xf32>
    %66 = arith.addf %64, %65 : vector<2x128xf32>
    %67 = arith.negf %66 : vector<2x128xf32>
    %68 = math.exp %67 : vector<2x128xf32>
    %cst_27 = arith.constant 1.000000e+00 : f32
    %69 = vector.broadcast %cst_27 : f32 to vector<2x128xf32>
    %70 = arith.addf %69, %68 : vector<2x128xf32>
    %71 = arith.divf %69, %70 : vector<2x128xf32>
    %72 = math.tanh %66 : vector<2x128xf32>
    %73 = vector.extract_strided_slice %71 {offsets = [0, 0], sizes = [2, 32], strides = [1, 1]} : vector<2x128xf32> to vector<2x32xf32>
    %74 = vector.extract_strided_slice %71 {offsets = [0, 32], sizes = [2, 32], strides = [1, 1]} : vector<2x128xf32> to vector<2x32xf32>
    %75 = vector.extract_strided_slice %72 {offsets = [0, 64], sizes = [2, 32], strides = [1, 1]} : vector<2x128xf32> to vector<2x32xf32>
    %76 = vector.extract_strided_slice %71 {offsets = [0, 96], sizes = [2, 32], strides = [1, 1]} : vector<2x128xf32> to vector<2x32xf32>
    %77 = arith.mulf %74, %61 : vector<2x32xf32>
    %78 = arith.mulf %73, %75 : vector<2x32xf32>
    %79 = arith.addf %77, %78 : vector<2x32xf32>
    %80 = math.tanh %79 : vector<2x32xf32>
    %81 = arith.mulf %76, %80 : vector<2x32xf32>
    %82 = vector.extract_strided_slice %13 {offsets = [6, 0], sizes = [2, 128], strides = [1, 1]} : vector<16x128xf32> to vector<2x128xf32>
    %cst_28 = arith.constant dense<0.000000e+00> : vector<2x128xf32>
    %83 = tpu.matmul %81, %2, %cst_28 {dimension_numbers = #tpu.dot_dimension_numbers<[1], [0], [0], [1], [0, 0, 1, 1], [], []>} : vector<2x32xf32>, vector<32x128xf32>, vector<2x128xf32> -> vector<2x128xf32>
    %84 = arith.addf %82, %83 : vector<2x128xf32>
    %85 = arith.negf %84 : vector<2x128xf32>
    %86 = math.exp %85 : vector<2x128xf32>
    %cst_29 = arith.constant 1.000000e+00 : f32
    %87 = vector.broadcast %cst_29 : f32 to vector<2x128xf32>
    %88 = arith.addf %87, %86 : vector<2x128xf32>
    %89 = arith.divf %87, %88 : vector<2x128xf32>
    %90 = math.tanh %84 : vector<2x128xf32>
    %91 = vector.extract_strided_slice %89 {offsets = [0, 0], sizes = [2, 32], strides = [1, 1]} : vector<2x128xf32> to vector<2x32xf32>
    %92 = vector.extract_strided_slice %89 {offsets = [0, 32], sizes = [2, 32], strides = [1, 1]} : vector<2x128xf32> to vector<2x32xf32>
    %93 = vector.extract_strided_slice %90 {offsets = [0, 64], sizes = [2, 32], strides = [1, 1]} : vector<2x128xf32> to vector<2x32xf32>
    %94 = vector.extract_strided_slice %89 {offsets = [0, 96], sizes = [2, 32], strides = [1, 1]} : vector<2x128xf32> to vector<2x32xf32>
    %95 = arith.mulf %92, %79 : vector<2x32xf32>
    %96 = arith.mulf %91, %93 : vector<2x32xf32>
    %97 = arith.addf %95, %96 : vector<2x32xf32>
    %98 = math.tanh %97 : vector<2x32xf32>
    %99 = arith.mulf %94, %98 : vector<2x32xf32>
    %100 = vector.extract_strided_slice %13 {offsets = [8, 0], sizes = [2, 128], strides = [1, 1]} : vector<16x128xf32> to vector<2x128xf32>
    %cst_30 = arith.constant dense<0.000000e+00> : vector<2x128xf32>
    %101 = tpu.matmul %99, %2, %cst_30 {dimension_numbers = #tpu.dot_dimension_numbers<[1], [0], [0], [1], [0, 0, 1, 1], [], []>} : vector<2x32xf32>, vector<32x128xf32>, vector<2x128xf32> -> vector<2x128xf32>
    %102 = arith.addf %100, %101 : vector<2x128xf32>
    %103 = arith.negf %102 : vector<2x128xf32>
    %104 = math.exp %103 : vector<2x128xf32>
    %cst_31 = arith.constant 1.000000e+00 : f32
    %105 = vector.broadcast %cst_31 : f32 to vector<2x128xf32>
    %106 = arith.addf %105, %104 : vector<2x128xf32>
    %107 = arith.divf %105, %106 : vector<2x128xf32>
    %108 = math.tanh %102 : vector<2x128xf32>
    %109 = vector.extract_strided_slice %107 {offsets = [0, 0], sizes = [2, 32], strides = [1, 1]} : vector<2x128xf32> to vector<2x32xf32>
    %110 = vector.extract_strided_slice %107 {offsets = [0, 32], sizes = [2, 32], strides = [1, 1]} : vector<2x128xf32> to vector<2x32xf32>
    %111 = vector.extract_strided_slice %108 {offsets = [0, 64], sizes = [2, 32], strides = [1, 1]} : vector<2x128xf32> to vector<2x32xf32>
    %112 = vector.extract_strided_slice %107 {offsets = [0, 96], sizes = [2, 32], strides = [1, 1]} : vector<2x128xf32> to vector<2x32xf32>
    %113 = arith.mulf %110, %97 : vector<2x32xf32>
    %114 = arith.mulf %109, %111 : vector<2x32xf32>
    %115 = arith.addf %113, %114 : vector<2x32xf32>
    %116 = math.tanh %115 : vector<2x32xf32>
    %117 = arith.mulf %112, %116 : vector<2x32xf32>
    %118 = vector.extract_strided_slice %13 {offsets = [10, 0], sizes = [2, 128], strides = [1, 1]} : vector<16x128xf32> to vector<2x128xf32>
    %cst_32 = arith.constant dense<0.000000e+00> : vector<2x128xf32>
    %119 = tpu.matmul %117, %2, %cst_32 {dimension_numbers = #tpu.dot_dimension_numbers<[1], [0], [0], [1], [0, 0, 1, 1], [], []>} : vector<2x32xf32>, vector<32x128xf32>, vector<2x128xf32> -> vector<2x128xf32>
    %120 = arith.addf %118, %119 : vector<2x128xf32>
    %121 = arith.negf %120 : vector<2x128xf32>
    %122 = math.exp %121 : vector<2x128xf32>
    %cst_33 = arith.constant 1.000000e+00 : f32
    %123 = vector.broadcast %cst_33 : f32 to vector<2x128xf32>
    %124 = arith.addf %123, %122 : vector<2x128xf32>
    %125 = arith.divf %123, %124 : vector<2x128xf32>
    %126 = math.tanh %120 : vector<2x128xf32>
    %127 = vector.extract_strided_slice %125 {offsets = [0, 0], sizes = [2, 32], strides = [1, 1]} : vector<2x128xf32> to vector<2x32xf32>
    %128 = vector.extract_strided_slice %125 {offsets = [0, 32], sizes = [2, 32], strides = [1, 1]} : vector<2x128xf32> to vector<2x32xf32>
    %129 = vector.extract_strided_slice %126 {offsets = [0, 64], sizes = [2, 32], strides = [1, 1]} : vector<2x128xf32> to vector<2x32xf32>
    %130 = vector.extract_strided_slice %125 {offsets = [0, 96], sizes = [2, 32], strides = [1, 1]} : vector<2x128xf32> to vector<2x32xf32>
    %131 = arith.mulf %128, %115 : vector<2x32xf32>
    %132 = arith.mulf %127, %129 : vector<2x32xf32>
    %133 = arith.addf %131, %132 : vector<2x32xf32>
    %134 = math.tanh %133 : vector<2x32xf32>
    %135 = arith.mulf %130, %134 : vector<2x32xf32>
    %136 = vector.extract_strided_slice %13 {offsets = [12, 0], sizes = [2, 128], strides = [1, 1]} : vector<16x128xf32> to vector<2x128xf32>
    %cst_34 = arith.constant dense<0.000000e+00> : vector<2x128xf32>
    %137 = tpu.matmul %135, %2, %cst_34 {dimension_numbers = #tpu.dot_dimension_numbers<[1], [0], [0], [1], [0, 0, 1, 1], [], []>} : vector<2x32xf32>, vector<32x128xf32>, vector<2x128xf32> -> vector<2x128xf32>
    %138 = arith.addf %136, %137 : vector<2x128xf32>
    %139 = arith.negf %138 : vector<2x128xf32>
    %140 = math.exp %139 : vector<2x128xf32>
    %cst_35 = arith.constant 1.000000e+00 : f32
    %141 = vector.broadcast %cst_35 : f32 to vector<2x128xf32>
    %142 = arith.addf %141, %140 : vector<2x128xf32>
    %143 = arith.divf %141, %142 : vector<2x128xf32>
    %144 = math.tanh %138 : vector<2x128xf32>
    %145 = vector.extract_strided_slice %143 {offsets = [0, 0], sizes = [2, 32], strides = [1, 1]} : vector<2x128xf32> to vector<2x32xf32>
    %146 = vector.extract_strided_slice %143 {offsets = [0, 32], sizes = [2, 32], strides = [1, 1]} : vector<2x128xf32> to vector<2x32xf32>
    %147 = vector.extract_strided_slice %144 {offsets = [0, 64], sizes = [2, 32], strides = [1, 1]} : vector<2x128xf32> to vector<2x32xf32>
    %148 = vector.extract_strided_slice %143 {offsets = [0, 96], sizes = [2, 32], strides = [1, 1]} : vector<2x128xf32> to vector<2x32xf32>
    %149 = arith.mulf %146, %133 : vector<2x32xf32>
    %150 = arith.mulf %145, %147 : vector<2x32xf32>
    %151 = arith.addf %149, %150 : vector<2x32xf32>
    %152 = math.tanh %151 : vector<2x32xf32>
    %153 = arith.mulf %148, %152 : vector<2x32xf32>
    %154 = vector.extract_strided_slice %13 {offsets = [14, 0], sizes = [2, 128], strides = [1, 1]} : vector<16x128xf32> to vector<2x128xf32>
    %cst_36 = arith.constant dense<0.000000e+00> : vector<2x128xf32>
    %155 = tpu.matmul %153, %2, %cst_36 {dimension_numbers = #tpu.dot_dimension_numbers<[1], [0], [0], [1], [0, 0, 1, 1], [], []>} : vector<2x32xf32>, vector<32x128xf32>, vector<2x128xf32> -> vector<2x128xf32>
    %156 = arith.addf %154, %155 : vector<2x128xf32>
    %157 = arith.negf %156 : vector<2x128xf32>
    %158 = math.exp %157 : vector<2x128xf32>
    %cst_37 = arith.constant 1.000000e+00 : f32
    %159 = vector.broadcast %cst_37 : f32 to vector<2x128xf32>
    %160 = arith.addf %159, %158 : vector<2x128xf32>
    %161 = arith.divf %159, %160 : vector<2x128xf32>
    %162 = math.tanh %156 : vector<2x128xf32>
    %163 = vector.extract_strided_slice %161 {offsets = [0, 0], sizes = [2, 32], strides = [1, 1]} : vector<2x128xf32> to vector<2x32xf32>
    %164 = vector.extract_strided_slice %161 {offsets = [0, 32], sizes = [2, 32], strides = [1, 1]} : vector<2x128xf32> to vector<2x32xf32>
    %165 = vector.extract_strided_slice %162 {offsets = [0, 64], sizes = [2, 32], strides = [1, 1]} : vector<2x128xf32> to vector<2x32xf32>
    %166 = vector.extract_strided_slice %161 {offsets = [0, 96], sizes = [2, 32], strides = [1, 1]} : vector<2x128xf32> to vector<2x32xf32>
    %167 = arith.mulf %164, %151 : vector<2x32xf32>
    %168 = arith.mulf %163, %165 : vector<2x32xf32>
    %169 = arith.addf %167, %168 : vector<2x32xf32>
    %170 = math.tanh %169 : vector<2x32xf32>
    %171 = arith.mulf %166, %170 : vector<2x32xf32>
    %cst_38 = arith.constant dense<0.000000e+00> : vector<2x128xf32>
    %172 = tpu.matmul %171, %3, %cst_38 {dimension_numbers = #tpu.dot_dimension_numbers<[1], [0], [0], [1], [0, 0, 1, 1], [], []>} : vector<2x32xf32>, vector<32x128xf32>, vector<2x128xf32> -> vector<2x128xf32>
    %173 = arith.addf %25, %172 : vector<2x128xf32>
    %174 = arith.negf %173 : vector<2x128xf32>
    %175 = math.exp %174 : vector<2x128xf32>
    %cst_39 = arith.constant 1.000000e+00 : f32
    %176 = vector.broadcast %cst_39 : f32 to vector<2x128xf32>
    %177 = arith.addf %176, %175 : vector<2x128xf32>
    %178 = arith.divf %176, %177 : vector<2x128xf32>
    %179 = math.tanh %173 : vector<2x128xf32>
    %180 = vector.extract_strided_slice %178 {offsets = [0, 0], sizes = [2, 32], strides = [1, 1]} : vector<2x128xf32> to vector<2x32xf32>
    %181 = vector.extract_strided_slice %178 {offsets = [0, 32], sizes = [2, 32], strides = [1, 1]} : vector<2x128xf32> to vector<2x32xf32>
    %182 = vector.extract_strided_slice %179 {offsets = [0, 64], sizes = [2, 32], strides = [1, 1]} : vector<2x128xf32> to vector<2x32xf32>
    %183 = vector.extract_strided_slice %178 {offsets = [0, 96], sizes = [2, 32], strides = [1, 1]} : vector<2x128xf32> to vector<2x32xf32>
    %184 = arith.mulf %181, %169 : vector<2x32xf32>
    %185 = arith.mulf %180, %182 : vector<2x32xf32>
    %186 = arith.addf %184, %185 : vector<2x32xf32>
    %187 = math.tanh %186 : vector<2x32xf32>
    %188 = arith.mulf %183, %187 : vector<2x32xf32>
    %c0_40 = arith.constant 0 : index
    %c0_41 = arith.constant 0 : index
    %189 = vector.load %arg7[%c0_40, %c0_41] : memref<24x32xf32, #tpu.memory_space<vmem>>, vector<2x32xf32>
    tpu.vector_store %arg7[%c0_40, %c0_41], %188 {strides = array<i32>} : memref<24x32xf32, #tpu.memory_space<vmem>>, vector<2x32xf32>,
    %190 = vector.extract_strided_slice %19 {offsets = [2, 0], sizes = [2, 128], strides = [1, 1]} : vector<24x128xf32> to vector<2x128xf32>
    %cst_42 = arith.constant dense<0.000000e+00> : vector<2x128xf32>
    %191 = tpu.matmul %188, %4, %cst_42 {dimension_numbers = #tpu.dot_dimension_numbers<[1], [0], [0], [1], [0, 0, 1, 1], [], []>} : vector<2x32xf32>, vector<32x128xf32>, vector<2x128xf32> -> vector<2x128xf32>
    %192 = arith.addf %190, %191 : vector<2x128xf32>
    %193 = arith.negf %192 : vector<2x128xf32>
    %194 = math.exp %193 : vector<2x128xf32>
    %cst_43 = arith.constant 1.000000e+00 : f32
    %195 = vector.broadcast %cst_43 : f32 to vector<2x128xf32>
    %196 = arith.addf %195, %194 : vector<2x128xf32>
    %197 = arith.divf %195, %196 : vector<2x128xf32>
    %198 = math.tanh %192 : vector<2x128xf32>
    %199 = vector.extract_strided_slice %197 {offsets = [0, 0], sizes = [2, 32], strides = [1, 1]} : vector<2x128xf32> to vector<2x32xf32>
    %200 = vector.extract_strided_slice %197 {offsets = [0, 32], sizes = [2, 32], strides = [1, 1]} : vector<2x128xf32> to vector<2x32xf32>
    %201 = vector.extract_strided_slice %198 {offsets = [0, 64], sizes = [2, 32], strides = [1, 1]} : vector<2x128xf32> to vector<2x32xf32>
    %202 = vector.extract_strided_slice %197 {offsets = [0, 96], sizes = [2, 32], strides = [1, 1]} : vector<2x128xf32> to vector<2x32xf32>
    %203 = arith.mulf %200, %186 : vector<2x32xf32>
    %204 = arith.mulf %199, %201 : vector<2x32xf32>
    %205 = arith.addf %203, %204 : vector<2x32xf32>
    %206 = math.tanh %205 : vector<2x32xf32>
    %207 = arith.mulf %202, %206 : vector<2x32xf32>
    %c2_44 = arith.constant 2 : index
    %c0_45 = arith.constant 0 : index
    %208 = vector.load %arg7[%c2_44, %c0_45] : memref<24x32xf32, #tpu.memory_space<vmem>>, vector<2x32xf32>
    tpu.vector_store %arg7[%c2_44, %c0_45], %207 {strides = array<i32>} : memref<24x32xf32, #tpu.memory_space<vmem>>, vector<2x32xf32>,
    %209 = vector.extract_strided_slice %19 {offsets = [4, 0], sizes = [2, 128], strides = [1, 1]} : vector<24x128xf32> to vector<2x128xf32>
    %cst_46 = arith.constant dense<0.000000e+00> : vector<2x128xf32>
    %210 = tpu.matmul %207, %4, %cst_46 {dimension_numbers = #tpu.dot_dimension_numbers<[1], [0], [0], [1], [0, 0, 1, 1], [], []>} : vector<2x32xf32>, vector<32x128xf32>, vector<2x128xf32> -> vector<2x128xf32>
    %211 = arith.addf %209, %210 : vector<2x128xf32>
    %212 = arith.negf %211 : vector<2x128xf32>
    %213 = math.exp %212 : vector<2x128xf32>
    %cst_47 = arith.constant 1.000000e+00 : f32
    %214 = vector.broadcast %cst_47 : f32 to vector<2x128xf32>
    %215 = arith.addf %214, %213 : vector<2x128xf32>
    %216 = arith.divf %214, %215 : vector<2x128xf32>
    %217 = math.tanh %211 : vector<2x128xf32>
    %218 = vector.extract_strided_slice %216 {offsets = [0, 0], sizes = [2, 32], strides = [1, 1]} : vector<2x128xf32> to vector<2x32xf32>
    %219 = vector.extract_strided_slice %216 {offsets = [0, 32], sizes = [2, 32], strides = [1, 1]} : vector<2x128xf32> to vector<2x32xf32>
    %220 = vector.extract_strided_slice %217 {offsets = [0, 64], sizes = [2, 32], strides = [1, 1]} : vector<2x128xf32> to vector<2x32xf32>
    %221 = vector.extract_strided_slice %216 {offsets = [0, 96], sizes = [2, 32], strides = [1, 1]} : vector<2x128xf32> to vector<2x32xf32>
    %222 = arith.mulf %219, %205 : vector<2x32xf32>
    %223 = arith.mulf %218, %220 : vector<2x32xf32>
    %224 = arith.addf %222, %223 : vector<2x32xf32>
    %225 = math.tanh %224 : vector<2x32xf32>
    %226 = arith.mulf %221, %225 : vector<2x32xf32>
    %c4_48 = arith.constant 4 : index
    %c0_49 = arith.constant 0 : index
    %227 = vector.load %arg7[%c4_48, %c0_49] : memref<24x32xf32, #tpu.memory_space<vmem>>, vector<2x32xf32>
    tpu.vector_store %arg7[%c4_48, %c0_49], %226 {strides = array<i32>} : memref<24x32xf32, #tpu.memory_space<vmem>>, vector<2x32xf32>,
    %228 = vector.extract_strided_slice %19 {offsets = [6, 0], sizes = [2, 128], strides = [1, 1]} : vector<24x128xf32> to vector<2x128xf32>
    %cst_50 = arith.constant dense<0.000000e+00> : vector<2x128xf32>
    %229 = tpu.matmul %226, %4, %cst_50 {dimension_numbers = #tpu.dot_dimension_numbers<[1], [0], [0], [1], [0, 0, 1, 1], [], []>} : vector<2x32xf32>, vector<32x128xf32>, vector<2x128xf32> -> vector<2x128xf32>
    %230 = arith.addf %228, %229 : vector<2x128xf32>
    %231 = arith.negf %230 : vector<2x128xf32>
    %232 = math.exp %231 : vector<2x128xf32>
    %cst_51 = arith.constant 1.000000e+00 : f32
    %233 = vector.broadcast %cst_51 : f32 to vector<2x128xf32>
    %234 = arith.addf %233, %232 : vector<2x128xf32>
    %235 = arith.divf %233, %234 : vector<2x128xf32>
    %236 = math.tanh %230 : vector<2x128xf32>
    %237 = vector.extract_strided_slice %235 {offsets = [0, 0], sizes = [2, 32], strides = [1, 1]} : vector<2x128xf32> to vector<2x32xf32>
    %238 = vector.extract_strided_slice %235 {offsets = [0, 32], sizes = [2, 32], strides = [1, 1]} : vector<2x128xf32> to vector<2x32xf32>
    %239 = vector.extract_strided_slice %236 {offsets = [0, 64], sizes = [2, 32], strides = [1, 1]} : vector<2x128xf32> to vector<2x32xf32>
    %240 = vector.extract_strided_slice %235 {offsets = [0, 96], sizes = [2, 32], strides = [1, 1]} : vector<2x128xf32> to vector<2x32xf32>
    %241 = arith.mulf %238, %224 : vector<2x32xf32>
    %242 = arith.mulf %237, %239 : vector<2x32xf32>
    %243 = arith.addf %241, %242 : vector<2x32xf32>
    %244 = math.tanh %243 : vector<2x32xf32>
    %245 = arith.mulf %240, %244 : vector<2x32xf32>
    %c6 = arith.constant 6 : index
    %c0_52 = arith.constant 0 : index
    %246 = vector.load %arg7[%c6, %c0_52] : memref<24x32xf32, #tpu.memory_space<vmem>>, vector<2x32xf32>
    tpu.vector_store %arg7[%c6, %c0_52], %245 {strides = array<i32>} : memref<24x32xf32, #tpu.memory_space<vmem>>, vector<2x32xf32>,
    %247 = vector.extract_strided_slice %19 {offsets = [8, 0], sizes = [2, 128], strides = [1, 1]} : vector<24x128xf32> to vector<2x128xf32>
    %cst_53 = arith.constant dense<0.000000e+00> : vector<2x128xf32>
    %248 = tpu.matmul %245, %4, %cst_53 {dimension_numbers = #tpu.dot_dimension_numbers<[1], [0], [0], [1], [0, 0, 1, 1], [], []>} : vector<2x32xf32>, vector<32x128xf32>, vector<2x128xf32> -> vector<2x128xf32>
    %249 = arith.addf %247, %248 : vector<2x128xf32>
    %250 = arith.negf %249 : vector<2x128xf32>
    %251 = math.exp %250 : vector<2x128xf32>
    %cst_54 = arith.constant 1.000000e+00 : f32
    %252 = vector.broadcast %cst_54 : f32 to vector<2x128xf32>
    %253 = arith.addf %252, %251 : vector<2x128xf32>
    %254 = arith.divf %252, %253 : vector<2x128xf32>
    %255 = math.tanh %249 : vector<2x128xf32>
    %256 = vector.extract_strided_slice %254 {offsets = [0, 0], sizes = [2, 32], strides = [1, 1]} : vector<2x128xf32> to vector<2x32xf32>
    %257 = vector.extract_strided_slice %254 {offsets = [0, 32], sizes = [2, 32], strides = [1, 1]} : vector<2x128xf32> to vector<2x32xf32>
    %258 = vector.extract_strided_slice %255 {offsets = [0, 64], sizes = [2, 32], strides = [1, 1]} : vector<2x128xf32> to vector<2x32xf32>
    %259 = vector.extract_strided_slice %254 {offsets = [0, 96], sizes = [2, 32], strides = [1, 1]} : vector<2x128xf32> to vector<2x32xf32>
    %260 = arith.mulf %257, %243 : vector<2x32xf32>
    %261 = arith.mulf %256, %258 : vector<2x32xf32>
    %262 = arith.addf %260, %261 : vector<2x32xf32>
    %263 = math.tanh %262 : vector<2x32xf32>
    %264 = arith.mulf %259, %263 : vector<2x32xf32>
    %c8 = arith.constant 8 : index
    %c0_55 = arith.constant 0 : index
    %265 = vector.load %arg7[%c8, %c0_55] : memref<24x32xf32, #tpu.memory_space<vmem>>, vector<2x32xf32>
    tpu.vector_store %arg7[%c8, %c0_55], %264 {strides = array<i32>} : memref<24x32xf32, #tpu.memory_space<vmem>>, vector<2x32xf32>,
    %266 = vector.extract_strided_slice %19 {offsets = [10, 0], sizes = [2, 128], strides = [1, 1]} : vector<24x128xf32> to vector<2x128xf32>
    %cst_56 = arith.constant dense<0.000000e+00> : vector<2x128xf32>
    %267 = tpu.matmul %264, %4, %cst_56 {dimension_numbers = #tpu.dot_dimension_numbers<[1], [0], [0], [1], [0, 0, 1, 1], [], []>} : vector<2x32xf32>, vector<32x128xf32>, vector<2x128xf32> -> vector<2x128xf32>
    %268 = arith.addf %266, %267 : vector<2x128xf32>
    %269 = arith.negf %268 : vector<2x128xf32>
    %270 = math.exp %269 : vector<2x128xf32>
    %cst_57 = arith.constant 1.000000e+00 : f32
    %271 = vector.broadcast %cst_57 : f32 to vector<2x128xf32>
    %272 = arith.addf %271, %270 : vector<2x128xf32>
    %273 = arith.divf %271, %272 : vector<2x128xf32>
    %274 = math.tanh %268 : vector<2x128xf32>
    %275 = vector.extract_strided_slice %273 {offsets = [0, 0], sizes = [2, 32], strides = [1, 1]} : vector<2x128xf32> to vector<2x32xf32>
    %276 = vector.extract_strided_slice %273 {offsets = [0, 32], sizes = [2, 32], strides = [1, 1]} : vector<2x128xf32> to vector<2x32xf32>
    %277 = vector.extract_strided_slice %274 {offsets = [0, 64], sizes = [2, 32], strides = [1, 1]} : vector<2x128xf32> to vector<2x32xf32>
    %278 = vector.extract_strided_slice %273 {offsets = [0, 96], sizes = [2, 32], strides = [1, 1]} : vector<2x128xf32> to vector<2x32xf32>
    %279 = arith.mulf %276, %262 : vector<2x32xf32>
    %280 = arith.mulf %275, %277 : vector<2x32xf32>
    %281 = arith.addf %279, %280 : vector<2x32xf32>
    %282 = math.tanh %281 : vector<2x32xf32>
    %283 = arith.mulf %278, %282 : vector<2x32xf32>
    %c10 = arith.constant 10 : index
    %c0_58 = arith.constant 0 : index
    %284 = vector.load %arg7[%c10, %c0_58] : memref<24x32xf32, #tpu.memory_space<vmem>>, vector<2x32xf32>
    tpu.vector_store %arg7[%c10, %c0_58], %283 {strides = array<i32>} : memref<24x32xf32, #tpu.memory_space<vmem>>, vector<2x32xf32>,
    %285 = vector.extract_strided_slice %19 {offsets = [12, 0], sizes = [2, 128], strides = [1, 1]} : vector<24x128xf32> to vector<2x128xf32>
    %cst_59 = arith.constant dense<0.000000e+00> : vector<2x128xf32>
    %286 = tpu.matmul %283, %4, %cst_59 {dimension_numbers = #tpu.dot_dimension_numbers<[1], [0], [0], [1], [0, 0, 1, 1], [], []>} : vector<2x32xf32>, vector<32x128xf32>, vector<2x128xf32> -> vector<2x128xf32>
    %287 = arith.addf %285, %286 : vector<2x128xf32>
    %288 = arith.negf %287 : vector<2x128xf32>
    %289 = math.exp %288 : vector<2x128xf32>
    %cst_60 = arith.constant 1.000000e+00 : f32
    %290 = vector.broadcast %cst_60 : f32 to vector<2x128xf32>
    %291 = arith.addf %290, %289 : vector<2x128xf32>
    %292 = arith.divf %290, %291 : vector<2x128xf32>
    %293 = math.tanh %287 : vector<2x128xf32>
    %294 = vector.extract_strided_slice %292 {offsets = [0, 0], sizes = [2, 32], strides = [1, 1]} : vector<2x128xf32> to vector<2x32xf32>
    %295 = vector.extract_strided_slice %292 {offsets = [0, 32], sizes = [2, 32], strides = [1, 1]} : vector<2x128xf32> to vector<2x32xf32>
    %296 = vector.extract_strided_slice %293 {offsets = [0, 64], sizes = [2, 32], strides = [1, 1]} : vector<2x128xf32> to vector<2x32xf32>
    %297 = vector.extract_strided_slice %292 {offsets = [0, 96], sizes = [2, 32], strides = [1, 1]} : vector<2x128xf32> to vector<2x32xf32>
    %298 = arith.mulf %295, %281 : vector<2x32xf32>
    %299 = arith.mulf %294, %296 : vector<2x32xf32>
    %300 = arith.addf %298, %299 : vector<2x32xf32>
    %301 = math.tanh %300 : vector<2x32xf32>
    %302 = arith.mulf %297, %301 : vector<2x32xf32>
    %c12 = arith.constant 12 : index
    %c0_61 = arith.constant 0 : index
    %303 = vector.load %arg7[%c12, %c0_61] : memref<24x32xf32, #tpu.memory_space<vmem>>, vector<2x32xf32>
    tpu.vector_store %arg7[%c12, %c0_61], %302 {strides = array<i32>} : memref<24x32xf32, #tpu.memory_space<vmem>>, vector<2x32xf32>,
    %304 = vector.extract_strided_slice %19 {offsets = [14, 0], sizes = [2, 128], strides = [1, 1]} : vector<24x128xf32> to vector<2x128xf32>
    %cst_62 = arith.constant dense<0.000000e+00> : vector<2x128xf32>
    %305 = tpu.matmul %302, %4, %cst_62 {dimension_numbers = #tpu.dot_dimension_numbers<[1], [0], [0], [1], [0, 0, 1, 1], [], []>} : vector<2x32xf32>, vector<32x128xf32>, vector<2x128xf32> -> vector<2x128xf32>
    %306 = arith.addf %304, %305 : vector<2x128xf32>
    %307 = arith.negf %306 : vector<2x128xf32>
    %308 = math.exp %307 : vector<2x128xf32>
    %cst_63 = arith.constant 1.000000e+00 : f32
    %309 = vector.broadcast %cst_63 : f32 to vector<2x128xf32>
    %310 = arith.addf %309, %308 : vector<2x128xf32>
    %311 = arith.divf %309, %310 : vector<2x128xf32>
    %312 = math.tanh %306 : vector<2x128xf32>
    %313 = vector.extract_strided_slice %311 {offsets = [0, 0], sizes = [2, 32], strides = [1, 1]} : vector<2x128xf32> to vector<2x32xf32>
    %314 = vector.extract_strided_slice %311 {offsets = [0, 32], sizes = [2, 32], strides = [1, 1]} : vector<2x128xf32> to vector<2x32xf32>
    %315 = vector.extract_strided_slice %312 {offsets = [0, 64], sizes = [2, 32], strides = [1, 1]} : vector<2x128xf32> to vector<2x32xf32>
    %316 = vector.extract_strided_slice %311 {offsets = [0, 96], sizes = [2, 32], strides = [1, 1]} : vector<2x128xf32> to vector<2x32xf32>
    %317 = arith.mulf %314, %300 : vector<2x32xf32>
    %318 = arith.mulf %313, %315 : vector<2x32xf32>
    %319 = arith.addf %317, %318 : vector<2x32xf32>
    %320 = math.tanh %319 : vector<2x32xf32>
    %321 = arith.mulf %316, %320 : vector<2x32xf32>
    %c14 = arith.constant 14 : index
    %c0_64 = arith.constant 0 : index
    %322 = vector.load %arg7[%c14, %c0_64] : memref<24x32xf32, #tpu.memory_space<vmem>>, vector<2x32xf32>
    tpu.vector_store %arg7[%c14, %c0_64], %321 {strides = array<i32>} : memref<24x32xf32, #tpu.memory_space<vmem>>, vector<2x32xf32>,
    %323 = vector.extract_strided_slice %19 {offsets = [16, 0], sizes = [2, 128], strides = [1, 1]} : vector<24x128xf32> to vector<2x128xf32>
    %cst_65 = arith.constant dense<0.000000e+00> : vector<2x128xf32>
    %324 = tpu.matmul %321, %4, %cst_65 {dimension_numbers = #tpu.dot_dimension_numbers<[1], [0], [0], [1], [0, 0, 1, 1], [], []>} : vector<2x32xf32>, vector<32x128xf32>, vector<2x128xf32> -> vector<2x128xf32>
    %325 = arith.addf %323, %324 : vector<2x128xf32>
    %326 = arith.negf %325 : vector<2x128xf32>
    %327 = math.exp %326 : vector<2x128xf32>
    %cst_66 = arith.constant 1.000000e+00 : f32
    %328 = vector.broadcast %cst_66 : f32 to vector<2x128xf32>
    %329 = arith.addf %328, %327 : vector<2x128xf32>
    %330 = arith.divf %328, %329 : vector<2x128xf32>
    %331 = math.tanh %325 : vector<2x128xf32>
    %332 = vector.extract_strided_slice %330 {offsets = [0, 0], sizes = [2, 32], strides = [1, 1]} : vector<2x128xf32> to vector<2x32xf32>
    %333 = vector.extract_strided_slice %330 {offsets = [0, 32], sizes = [2, 32], strides = [1, 1]} : vector<2x128xf32> to vector<2x32xf32>
    %334 = vector.extract_strided_slice %331 {offsets = [0, 64], sizes = [2, 32], strides = [1, 1]} : vector<2x128xf32> to vector<2x32xf32>
    %335 = vector.extract_strided_slice %330 {offsets = [0, 96], sizes = [2, 32], strides = [1, 1]} : vector<2x128xf32> to vector<2x32xf32>
    %336 = arith.mulf %333, %319 : vector<2x32xf32>
    %337 = arith.mulf %332, %334 : vector<2x32xf32>
    %338 = arith.addf %336, %337 : vector<2x32xf32>
    %339 = math.tanh %338 : vector<2x32xf32>
    %340 = arith.mulf %335, %339 : vector<2x32xf32>
    %c16 = arith.constant 16 : index
    %c0_67 = arith.constant 0 : index
    %341 = vector.load %arg7[%c16, %c0_67] : memref<24x32xf32, #tpu.memory_space<vmem>>, vector<2x32xf32>
    tpu.vector_store %arg7[%c16, %c0_67], %340 {strides = array<i32>} : memref<24x32xf32, #tpu.memory_space<vmem>>, vector<2x32xf32>,
    %342 = vector.extract_strided_slice %19 {offsets = [18, 0], sizes = [2, 128], strides = [1, 1]} : vector<24x128xf32> to vector<2x128xf32>
    %cst_68 = arith.constant dense<0.000000e+00> : vector<2x128xf32>
    %343 = tpu.matmul %340, %4, %cst_68 {dimension_numbers = #tpu.dot_dimension_numbers<[1], [0], [0], [1], [0, 0, 1, 1], [], []>} : vector<2x32xf32>, vector<32x128xf32>, vector<2x128xf32> -> vector<2x128xf32>
    %344 = arith.addf %342, %343 : vector<2x128xf32>
    %345 = arith.negf %344 : vector<2x128xf32>
    %346 = math.exp %345 : vector<2x128xf32>
    %cst_69 = arith.constant 1.000000e+00 : f32
    %347 = vector.broadcast %cst_69 : f32 to vector<2x128xf32>
    %348 = arith.addf %347, %346 : vector<2x128xf32>
    %349 = arith.divf %347, %348 : vector<2x128xf32>
    %350 = math.tanh %344 : vector<2x128xf32>
    %351 = vector.extract_strided_slice %349 {offsets = [0, 0], sizes = [2, 32], strides = [1, 1]} : vector<2x128xf32> to vector<2x32xf32>
    %352 = vector.extract_strided_slice %349 {offsets = [0, 32], sizes = [2, 32], strides = [1, 1]} : vector<2x128xf32> to vector<2x32xf32>
    %353 = vector.extract_strided_slice %350 {offsets = [0, 64], sizes = [2, 32], strides = [1, 1]} : vector<2x128xf32> to vector<2x32xf32>
    %354 = vector.extract_strided_slice %349 {offsets = [0, 96], sizes = [2, 32], strides = [1, 1]} : vector<2x128xf32> to vector<2x32xf32>
    %355 = arith.mulf %352, %338 : vector<2x32xf32>
    %356 = arith.mulf %351, %353 : vector<2x32xf32>
    %357 = arith.addf %355, %356 : vector<2x32xf32>
    %358 = math.tanh %357 : vector<2x32xf32>
    %359 = arith.mulf %354, %358 : vector<2x32xf32>
    %c18 = arith.constant 18 : index
    %c0_70 = arith.constant 0 : index
    %360 = vector.load %arg7[%c18, %c0_70] : memref<24x32xf32, #tpu.memory_space<vmem>>, vector<2x32xf32>
    tpu.vector_store %arg7[%c18, %c0_70], %359 {strides = array<i32>} : memref<24x32xf32, #tpu.memory_space<vmem>>, vector<2x32xf32>,
    %361 = vector.extract_strided_slice %19 {offsets = [20, 0], sizes = [2, 128], strides = [1, 1]} : vector<24x128xf32> to vector<2x128xf32>
    %cst_71 = arith.constant dense<0.000000e+00> : vector<2x128xf32>
    %362 = tpu.matmul %359, %4, %cst_71 {dimension_numbers = #tpu.dot_dimension_numbers<[1], [0], [0], [1], [0, 0, 1, 1], [], []>} : vector<2x32xf32>, vector<32x128xf32>, vector<2x128xf32> -> vector<2x128xf32>
    %363 = arith.addf %361, %362 : vector<2x128xf32>
    %364 = arith.negf %363 : vector<2x128xf32>
    %365 = math.exp %364 : vector<2x128xf32>
    %cst_72 = arith.constant 1.000000e+00 : f32
    %366 = vector.broadcast %cst_72 : f32 to vector<2x128xf32>
    %367 = arith.addf %366, %365 : vector<2x128xf32>
    %368 = arith.divf %366, %367 : vector<2x128xf32>
    %369 = math.tanh %363 : vector<2x128xf32>
    %370 = vector.extract_strided_slice %368 {offsets = [0, 0], sizes = [2, 32], strides = [1, 1]} : vector<2x128xf32> to vector<2x32xf32>
    %371 = vector.extract_strided_slice %368 {offsets = [0, 32], sizes = [2, 32], strides = [1, 1]} : vector<2x128xf32> to vector<2x32xf32>
    %372 = vector.extract_strided_slice %369 {offsets = [0, 64], sizes = [2, 32], strides = [1, 1]} : vector<2x128xf32> to vector<2x32xf32>
    %373 = vector.extract_strided_slice %368 {offsets = [0, 96], sizes = [2, 32], strides = [1, 1]} : vector<2x128xf32> to vector<2x32xf32>
    %374 = arith.mulf %371, %357 : vector<2x32xf32>
    %375 = arith.mulf %370, %372 : vector<2x32xf32>
    %376 = arith.addf %374, %375 : vector<2x32xf32>
    %377 = math.tanh %376 : vector<2x32xf32>
    %378 = arith.mulf %373, %377 : vector<2x32xf32>
    %c20 = arith.constant 20 : index
    %c0_73 = arith.constant 0 : index
    %379 = vector.load %arg7[%c20, %c0_73] : memref<24x32xf32, #tpu.memory_space<vmem>>, vector<2x32xf32>
    tpu.vector_store %arg7[%c20, %c0_73], %378 {strides = array<i32>} : memref<24x32xf32, #tpu.memory_space<vmem>>, vector<2x32xf32>,
    %380 = vector.extract_strided_slice %19 {offsets = [22, 0], sizes = [2, 128], strides = [1, 1]} : vector<24x128xf32> to vector<2x128xf32>
    %cst_74 = arith.constant dense<0.000000e+00> : vector<2x128xf32>
    %381 = tpu.matmul %378, %4, %cst_74 {dimension_numbers = #tpu.dot_dimension_numbers<[1], [0], [0], [1], [0, 0, 1, 1], [], []>} : vector<2x32xf32>, vector<32x128xf32>, vector<2x128xf32> -> vector<2x128xf32>
    %382 = arith.addf %380, %381 : vector<2x128xf32>
    %383 = arith.negf %382 : vector<2x128xf32>
    %384 = math.exp %383 : vector<2x128xf32>
    %cst_75 = arith.constant 1.000000e+00 : f32
    %385 = vector.broadcast %cst_75 : f32 to vector<2x128xf32>
    %386 = arith.addf %385, %384 : vector<2x128xf32>
    %387 = arith.divf %385, %386 : vector<2x128xf32>
    %388 = math.tanh %382 : vector<2x128xf32>
    %389 = vector.extract_strided_slice %387 {offsets = [0, 0], sizes = [2, 32], strides = [1, 1]} : vector<2x128xf32> to vector<2x32xf32>
    %390 = vector.extract_strided_slice %387 {offsets = [0, 32], sizes = [2, 32], strides = [1, 1]} : vector<2x128xf32> to vector<2x32xf32>
    %391 = vector.extract_strided_slice %388 {offsets = [0, 64], sizes = [2, 32], strides = [1, 1]} : vector<2x128xf32> to vector<2x32xf32>
    %392 = vector.extract_strided_slice %387 {offsets = [0, 96], sizes = [2, 32], strides = [1, 1]} : vector<2x128xf32> to vector<2x32xf32>
    %393 = arith.mulf %390, %376 : vector<2x32xf32>
    %394 = arith.mulf %389, %391 : vector<2x32xf32>
    %395 = arith.addf %393, %394 : vector<2x32xf32>
    %396 = math.tanh %395 : vector<2x32xf32>
    %397 = arith.mulf %392, %396 : vector<2x32xf32>
    %c22 = arith.constant 22 : index
    %c0_76 = arith.constant 0 : index
    %398 = vector.load %arg7[%c22, %c0_76] : memref<24x32xf32, #tpu.memory_space<vmem>>, vector<2x32xf32>
    tpu.vector_store %arg7[%c22, %c0_76], %397 {strides = array<i32>} : memref<24x32xf32, #tpu.memory_space<vmem>>, vector<2x32xf32>,
    %c0_77 = arith.constant 0 : index
    %c0_78 = arith.constant 0 : index
    %399 = vector.load %arg7[%c0_77, %c0_78] : memref<24x32xf32, #tpu.memory_space<vmem>>, vector<24x32xf32>
    %cst_79 = arith.constant dense<0.000000e+00> : vector<24x4xf32>
    %400 = tpu.matmul %399, %8, %cst_79 {dimension_numbers = #tpu.dot_dimension_numbers<[1], [0], [0], [1], [0, 0, 1, 1], [], []>} : vector<24x32xf32>, vector<32x4xf32>, vector<24x4xf32> -> vector<24x4xf32>
    %401 = vector.broadcast %9 : vector<1x4xf32> to vector<24x4xf32>
    %402 = arith.addf %400, %401 : vector<24x4xf32>
    %c0_80 = arith.constant 0 : index
    %c0_81 = arith.constant 0 : index
    %403 = vector.load %arg6[%c0_80, %c0_81] : memref<24x4xf32, #tpu.memory_space<vmem>>, vector<24x4xf32>
    tpu.vector_store %arg6[%c0_80, %c0_81], %402 {strides = array<i32>} : memref<24x4xf32, #tpu.memory_space<vmem>>, vector<24x4xf32>,
    return
  }
}

</mosaic_0001>

<bundles_post_ra>
// kernel: hydro_seq2seq.1
= control target key start
LH: loop header
LB: loop body
LE: loop exit
PB: predicated region body
PF: predicated region fallthrough
CT: control target
= control target key end

     0   :  { %vm58_vm0 = vcmask 1043456   ;;  %vm51_vm1 = vcmask 31744   ;;  %v3142_v2 = vmov 0.0|0.0   ;;  %vm3143_vm2 = vmmov 0   ;;  %s3145_s12 = smov 64   ;;  %s3146_s13 = smov 32   ;;  %s3602_s2 = inlined_call_operand.vmem [shape: f32[5,128], index: 2, kind: input, shape index: {}]   ;;  %s3603_s0 = inlined_call_operand.vmem [shape: f32[16,4], index: 0, kind: input, shape index: {}]   ;;  %s3604_s3 = inlined_call_operand.vmem [shape: f32[96,128], index: 3, kind: input, shape index: {}]   ;;  %s3605_s4 = inlined_call_operand.vmem [shape: f32[3,128], index: 4, kind: input, shape index: {}]   ;;  %s3606_s1 = inlined_call_operand.vmem [shape: f32[24,1], index: 1, kind: input, shape index: {}]   ;;  %s3607_s5 = inlined_call_operand.vmem [shape: f32[33,4], index: 5, kind: input, shape index: {}]   ;;  %s3608_s6 = inlined_call_operand.vmem [shape: f32[24,4], index: 6, kind: output, shape index: {}]  }
   0x1   :  { %v23_v0 = vld [vmem:[%s3602_s2] sm:$0xf]  ;;  %2860 = vmatprep.subr.bf16.mxu1 %v3142_v2  ;;  %v46_v3 = vld [vmem:[%s3603_s0 + $0x8] sm:$0xff]  ;;  %v27_v7 = vld [vmem:[%s3604_s3 + $0x10] sm:$0xff]  ;;  %v3144_v9 = vmov 0.0   ;;  %vm181_vm3 = vcmask 261120  }
   0x2   :  { %v45_v1 = vld [vmem:[%s3603_s0] sm:$0xff]  ;;  %2606 = vmatprep.subr.msk.mxu0 %vm58_vm0, %v23_v0  ;;  %v26_v5 = vld [vmem:[%s3604_s3 + $0x8] sm:$0xff]  ;;  %v28_v8 = vld [vmem:[%s3604_s3 + $0x18] sm:$0xff]  ;;  %2641 = vmatprep.mubr.msk.f32.mxu1 %vm3143_vm2, %v3144_v9  ;;  %vm1132_vm4 = vcmask 254976   ;;  %vm1241_vm5 = vcmask 257026   ;;  %vm1465_vm6 = vcmask 261126  }
   0x3   :  { %2608 = vmatprep.mubr.msk.f32.mxu0 %vm51_vm1, %v45_v1  ;;  %v25_v4 = vld [vmem:[%s3604_s3] sm:$0xff]  ;;  %2607 = vmatpush3.msk.msra.mxu0 %vm58_vm0, %v23_v0  ;;  %v3213_v10 = vpack.c.bf16 %v28_v8, %v27_v7  ;;  %vm1353_vm7 = vcmask 259076  }
   0x4   :  { %v3200_v6 = vpack.c.bf16 %v26_v5, %v25_v4  ;;  %2609 = vmatmul.mubr.msk.f32.vlgmr.msra.gmra.mrb[0].mxu0 %vm51_vm1, %v46_v3  ;;  %2848 = vmatprep.subr.bf16.mxu0 %v3142_v2  ;;  %v2446_v11 = vld [vmem:[%s3605_s4] ss:$0 sm:$0xff] }
   0x5   :  { %2619 = vmatprep.mubr.msk.f32.mxu0 %vm3143_vm2, %v3144_v9 }
   0x6   :  { %2850 = vmatpush3.bf16.msra.mxu0 %v3200_v6  ;;  %2862 = vmatpush3.bf16.msra.mxu1 %v3200_v6 }
   0x7   :  { %2851 = vmatprep.subr.bf16.mxu0 %v3142_v2  ;;  %2863 = vmatprep.subr.bf16.mxu1 %v3142_v2 }
   0xa   :  { %2853 = vmatpush3.bf16.msra.mxu0 %v3213_v10  ;;  %2865 = vmatpush3.bf16.msra.mxu1 %v3213_v10 }
   0xb   :  { %2854 = vmatprep.subr.bf16.mxu0 %v3142_v2  ;;  %2872 = vmatprep.subr.bf16.mxu1 %v3142_v2 }
   0xd   :  { %2620 = vmatmul.mubr.f32.vlgmr.msra.gmra.mrb[2].mxu0 %v3144_v9 }
   0xe   :  { %2856 = vmatpush3.bf16.msra.mxu0 %v3200_v6  ;;  %2630 = vmatprep.mubr.msk.f32.mxu0 %vm3143_vm2, %v3144_v9 }
   0xf   :  { %2857 = vmatprep.subr.bf16.mxu0 %v3142_v2 }
  0x12   :  { %2859 = vmatpush3.bf16.msra.mxu0 %v3213_v10 }
  0x13   :  { %2866 = vmatprep.subr.bf16.mxu0 %v3142_v2 }
  0xd7   :  { %v2610_v12 = vpop.f32.mrb[0].mxu0 }
  0xd8   :  { %v3234_v13 = vadd.f32 %v2610_v12, %v2446_v11  ;;  %v128_v14 = vpop.f32.mrb[1].mxu0 }
  0xd9   :  { %v3236_v15 = vadd.f32 %v2446_v11, %v128_v14 }
  0xe0   :  { %v251_v16 = vpop.f32.mrb[2].mxu0 }
  0xe1   :  { %v255_v17 = vadd.f32 %v251_v16, %v3236_v15  ;;  %v2621_v18 = vpop.f32.mrb[3].mxu0 }
  0xe3   :  { %2982 = vtanh.f32 %v255_v17  ;;  %v2453_v20 = vmul.f32 -1.442695, %v255_v17 }
  0xe5   :  { %2984 = vpow2.f32 %v2453_v20 }
  0xed   :  { %v2983_v19 = vpop.eup %2982 }
  0xee   :  { %265 = vrot.lane.b32.xlu0 %v2983_v19, %s3145_s12 }
  0xef   :  { %v2985_v21 = vpop.eup %2984 }
  0xf0   :  { %v259_v22 = vadd.f32 1.0, %v2985_v21 }
  0xf2   :  { %2986 = vrcp.f32 %v259_v22 }
  0xfc   :  { %v2987_v23 = vpop.eup %2986 }
  0xfd   :  { %v263_v26 = vmul.f32 0.0, %v2987_v23 }
 0x160   :  { %v266_v24 = vpop.permute.xlu0 %265 }
 0x161   :  { %v268_v25 = vmul.f32 %v2987_v23, %v266_v24 }
 0x163   :  { %270 = vrot.lane.b32.xlu0 %v268_v25, %s3146_s13 }
 0x1d5   :  { %v271_v27 = vpop.permute.xlu0 %270 }
 0x1d6   :  { %v273_v28 = vadd.f32 %v271_v27, %v263_v26 }
 0x1d8   :  { %2988 = vtanh.f32 %v273_v28  ;;  %v367_v44 = vrot.slane %v273_v28, 6 }
 0x1e2   :  { %v2989_v29 = vpop.eup %2988 }
 0x1e3   :  { %276 = vrot.lane.b32.xlu1 %v2989_v29, %s3145_s12 }
 0x255   :  { %v277_v30 = vpop.permute.xlu1 %276 }
 0x256   :  { %v279_v31 = vmul.f32 %v2987_v23, %v277_v30 }
 0x258   :  { %281 = vrot.lane.b32.xlu1 %v279_v31, %s3146_s13 }
 0x2ca   :  { %v282_v32 = vpop.permute.xlu1 %281 }
 0x2cb   :  { %2631 = vmatmul.mubr.msk.f32.vlgmr.msra.gmra.mrb[4].mxu0 %vm181_vm3, %v282_v32 }
 0x2cc   :  { %2868 = vmatpush3.bf16.msra.mxu0 %v3200_v6  ;;  %2652 = vmatprep.mubr.msk.f32.mxu0 %vm3143_vm2, %v3144_v9 }
 0x2cd   :  { %2869 = vmatprep.subr.bf16.mxu0 %v3142_v2 }
 0x2d0   :  { %2871 = vmatpush3.bf16.msra.mxu0 %v3213_v10 }
 0x2d1   :  { %2878 = vmatprep.subr.bf16.mxu0 %v3142_v2 }
 0x39e   :  { %v351_v33 = vpop.f32.mrb[4].mxu0 }
 0x39f   :  { %v356_v34 = vrot.slane %v351_v33, 6  ;;  %v2632_v35 = vpop.f32.mrb[5].mxu0 }
 0x3a1   :  { %v358_v36 = vadd.f32 %v356_v34, %v3236_v15 }
 0x3a3   :  { %2990 = vtanh.f32 %v358_v36  ;;  %v2455_v38 = vmul.f32 -1.442695, %v358_v36 }
 0x3a5   :  { %2992 = vpow2.f32 %v2455_v38 }
 0x3ad   :  { %v2991_v37 = vpop.eup %2990 }
 0x3ae   :  { %371 = vrot.lane.b32.xlu0 %v2991_v37, %s3145_s12 }
 0x3af   :  { %v2993_v39 = vpop.eup %2992 }
 0x3b0   :  { %v362_v40 = vadd.f32 1.0, %v2993_v39 }
 0x3b2   :  { %2994 = vrcp.f32 %v362_v40 }
 0x3bc   :  { %v2995_v41 = vpop.eup %2994 }
 0x3bd   :  { %v369_v45 = vmul.f32 %v2995_v41, %v367_v44 }
 0x420   :  { %v372_v42 = vpop.permute.xlu0 %371 }
 0x421   :  { %v374_v43 = vmul.f32 %v2995_v41, %v372_v42 }
 0x423   :  { %376 = vrot.lane.b32.xlu1 %v374_v43, %s3146_s13 }
 0x495   :  { %v377_v46 = vpop.permute.xlu1 %376 }
 0x496   :  { %v379_v47 = vadd.f32 %v377_v46, %v369_v45 }
 0x498   :  { %2996 = vtanh.f32 %v379_v47  ;;  %v474_v0 = vrot.slane %v379_v47, 6 }
 0x4a2   :  { %v2997_v48 = vpop.eup %2996 }
 0x4a3   :  { %382 = vrot.lane.b32.xlu0 %v2997_v48, %s3145_s12 }
 0x515   :  { %v383_v49 = vpop.permute.xlu0 %382 }
 0x516   :  { %v385_v50 = vmul.f32 %v2995_v41, %v383_v49 }
 0x518   :  { %v387_v51 = vrot.slane %v385_v50, 2 }
 0x51a   :  { %388 = vrot.lane.b32.xlu1 %v387_v51, %s3146_s13 }
 0x58c   :  { %v389_v52 = vpop.permute.xlu1 %388 }
 0x58d   :  { %2642 = vmatmul.mubr.msk.f32.vlgmr.msra.gmra.mrb[0].mxu1 %vm181_vm3, %v389_v52 }
 0x58e   :  { %2874 = vmatpush3.bf16.msra.mxu1 %v3200_v6  ;;  %2663 = vmatprep.mubr.msk.f32.mxu1 %vm3143_vm2, %v3144_v9 }
 0x58f   :  { %2875 = vmatprep.subr.bf16.mxu1 %v3142_v2 }
 0x592   :  { %2877 = vmatpush3.bf16.msra.mxu1 %v3213_v10 }
 0x593   :  { %2884 = vmatprep.subr.bf16.mxu1 %v3142_v2 }
 0x660   :  { %v458_v53 = vpop.f32.mrb[0].mxu1 }
 0x661   :  { %v463_v54 = vrot.slane %v458_v53, 4  ;;  %v2643_v55 = vpop.f32.mrb[1].mxu1 }
 0x663   :  { %v465_v56 = vadd.f32 %v463_v54, %v3236_v15 }
 0x665   :  { %2998 = vtanh.f32 %v465_v56  ;;  %v2457_v58 = vmul.f32 -1.442695, %v465_v56 }
 0x667   :  { %3000 = vpow2.f32 %v2457_v58 }
 0x66f   :  { %v2999_v57 = vpop.eup %2998 }
 0x670   :  { %478 = vrot.lane.b32.xlu0 %v2999_v57, %s3145_s12 }
 0x671   :  { %v3001_v59 = vpop.eup %3000 }
 0x672   :  { %v469_v60 = vadd.f32 1.0, %v3001_v59 }
 0x674   :  { %3002 = vrcp.f32 %v469_v60 }
 0x67e   :  { %v3003_v61 = vpop.eup %3002 }
 0x67f   :  { %v476_v1 = vmul.f32 %v3003_v61, %v474_v0 }
 0x6e2   :  { %v479_v62 = vpop.permute.xlu0 %478 }
 0x6e3   :  { %v481_v63 = vmul.f32 %v3003_v61, %v479_v62 }
 0x6e5   :  { %483 = vrot.lane.b32.xlu1 %v481_v63, %s3146_s13 }
 0x757   :  { %v484_v3 = vpop.permute.xlu1 %483 }
 0x758   :  { %v486_v4 = vadd.f32 %v484_v3, %v476_v1 }
 0x75a   :  { %3004 = vtanh.f32 %v486_v4  ;;  %v581_v26 = vrot.slane %v486_v4, 6 }
 0x764   :  { %v3005_v5 = vpop.eup %3004 }
 0x765   :  { %489 = vrot.lane.b32.xlu0 %v3005_v5, %s3145_s12 }
 0x7d7   :  { %v490_v7 = vpop.permute.xlu0 %489 }
 0x7d8   :  { %v492_v8 = vmul.f32 %v3003_v61, %v490_v7 }
 0x7da   :  { %v494_v11 = vrot.slane %v492_v8, 4 }
 0x7dc   :  { %495 = vrot.lane.b32.xlu1 %v494_v11, %s3146_s13 }
 0x84e   :  { %v496_v12 = vpop.permute.xlu1 %495 }
 0x84f   :  { %2653 = vmatmul.mubr.msk.f32.vlgmr.msra.gmra.mrb[6].mxu0 %vm181_vm3, %v496_v12 }
 0x850   :  { %2880 = vmatpush3.bf16.msra.mxu0 %v3200_v6  ;;  %2674 = vmatprep.mubr.msk.f32.mxu0 %vm3143_vm2, %v3144_v9 }
 0x851   :  { %2881 = vmatprep.subr.bf16.mxu0 %v3142_v2 }
 0x854   :  { %2883 = vmatpush3.bf16.msra.mxu0 %v3213_v10 }
 0x855   :  { %2890 = vmatprep.subr.bf16.mxu0 %v3142_v2 }
 0x922   :  { %v565_v14 = vpop.f32.mrb[6].mxu0 }
 0x923   :  { %v570_v16 = vrot.slane %v565_v14, 2  ;;  %v2654_v17 = vpop.f32.mrb[7].mxu0 }
 0x925   :  { %v572_v18 = vadd.f32 %v570_v16, %v3236_v15 }
 0x927   :  { %3006 = vtanh.f32 %v572_v18  ;;  %v2459_v20 = vmul.f32 -1.442695, %v572_v18 }
 0x929   :  { %3008 = vpow2.f32 %v2459_v20 }
 0x931   :  { %v3007_v19 = vpop.eup %3006 }
 0x932   :  { %585 = vrot.lane.b32.xlu0 %v3007_v19, %s3145_s12 }
 0x933   :  { %v3009_v21 = vpop.eup %3008 }
 0x934   :  { %v576_v22 = vadd.f32 1.0, %v3009_v21 }
 0x936   :  { %3010 = vrcp.f32 %v576_v22 }
 0x940   :  { %v3011_v23 = vpop.eup %3010 }
 0x941   :  { %v583_v27 = vmul.f32 %v3011_v23, %v581_v26 }
 0x9a4   :  { %v586_v24 = vpop.permute.xlu0 %585 }
 0x9a5   :  { %v588_v25 = vmul.f32 %v3011_v23, %v586_v24 }
 0x9a7   :  { %590 = vrot.lane.b32.xlu1 %v588_v25, %s3146_s13 }
 0xa19   :  { %v591_v28 = vpop.permute.xlu1 %590 }
 0xa1a   :  { %v593_v29 = vadd.f32 %v591_v28, %v583_v27 }
 0xa1c   :  { %3012 = vtanh.f32 %v593_v29  ;;  %v685_v44 = vrot.slane %v593_v29, 6 }
 0xa26   :  { %v3013_v15 = vpop.eup %3012 }
 0xa27   :  { %596 = vrot.lane.b32.xlu0 %v3013_v15, %s3145_s12 }
 0xa99   :  { %v597_v30 = vpop.permute.xlu0 %596 }
 0xa9a   :  { %v599_v31 = vmul.f32 %v3011_v23, %v597_v30 }
 0xa9c   :  { %v601_v32 = vrot.slane %v599_v31, 6 }
 0xa9e   :  { %602 = vrot.lane.b32.xlu1 %v601_v32, %s3146_s13 }
 0xb10   :  { %v603_v33 = vpop.permute.xlu1 %602 }
 0xb11   :  { %2664 = vmatmul.mubr.msk.f32.vlgmr.msra.gmra.mrb[2].mxu1 %vm181_vm3, %v603_v33 }
 0xb12   :  { %2886 = vmatpush3.bf16.msra.mxu1 %v3200_v6  ;;  %2685 = vmatprep.mubr.msk.f32.mxu1 %vm3143_vm2, %v3144_v9 }
 0xb13   :  { %2887 = vmatprep.subr.bf16.mxu1 %v3142_v2 }
 0xb16   :  { %2889 = vmatpush3.bf16.msra.mxu1 %v3213_v10 }
 0xb17   :  { %2896 = vmatprep.subr.bf16.mxu1 %v3142_v2 }
 0xbe4   :  { %v672_v34 = vpop.f32.mrb[2].mxu1 }
 0xbe5   :  { %v676_v35 = vadd.f32 %v672_v34, %v3234_v13  ;;  %v2665_v36 = vpop.f32.mrb[3].mxu1 }
 0xbe7   :  { %3014 = vtanh.f32 %v676_v35  ;;  %v2461_v38 = vmul.f32 -1.442695, %v676_v35 }
 0xbe9   :  { %3016 = vpow2.f32 %v2461_v38 }
 0xbf1   :  { %v3015_v37 = vpop.eup %3014 }
 0xbf2   :  { %689 = vrot.lane.b32.xlu0 %v3015_v37, %s3145_s12 }
 0xbf3   :  { %v3017_v39 = vpop.eup %3016 }
 0xbf4   :  { %v680_v40 = vadd.f32 1.0, %v3017_v39 }
 0xbf6   :  { %3018 = vrcp.f32 %v680_v40 }
 0xc00   :  { %v3019_v41 = vpop.eup %3018 }
 0xc01   :  { %v687_v45 = vmul.f32 %v3019_v41, %v685_v44 }
 0xc64   :  { %v690_v42 = vpop.permute.xlu0 %689 }
 0xc65   :  { %v692_v43 = vmul.f32 %v3019_v41, %v690_v42 }
 0xc67   :  { %694 = vrot.lane.b32.xlu1 %v692_v43, %s3146_s13 }
 0xcd9   :  { %v695_v46 = vpop.permute.xlu1 %694 }
 0xcda   :  { %v697_v47 = vadd.f32 %v695_v46, %v687_v45  ;;  %v30_v46 = vld [vmem:[%s3604_s3 + $0x28] sm:$0xff] }
 0xcdc   :  { %3020 = vtanh.f32 %v697_v47 }
 0xce6   :  { %v3021_v48 = vpop.eup %3020 }
 0xce7   :  { %700 = vrot.lane.b32.xlu0 %v3021_v48, %s3145_s12 }
 0xd59   :  { %v701_v49 = vpop.permute.xlu0 %700 }
 0xd5a   :  { %v703_v50 = vmul.f32 %v3019_v41, %v701_v49  ;;  %v32_v49 = vld [vmem:[%s3604_s3 + $0x38] sm:$0xff] }
 0xd5c   :  { %705 = vrot.lane.b32.xlu1 %v703_v50, %s3146_s13 }
 0xdce   :  { %v706_v51 = vpop.permute.xlu1 %705 }
 0xdcf   :  { %2675 = vmatmul.mubr.msk.f32.vlgmr.msra.gmra.mrb[8].mxu0 %vm181_vm3, %v706_v51 }
 0xdd0   :  { %2892 = vmatpush3.bf16.msra.mxu0 %v3200_v6  ;;  %2696 = vmatprep.mubr.msk.f32.mxu0 %vm3143_vm2, %v3144_v9 }
 0xdd1   :  { %2893 = vmatprep.subr.bf16.mxu0 %v3142_v2 }
 0xdd4   :  { %2895 = vmatpush3.bf16.msra.mxu0 %v3213_v10  ;;  %v791_v10 = vrot.slane %v697_v47, 6  ;;  %v31_v47 = vld [vmem:[%s3604_s3 + $0x30] sm:$0xff] }
 0xdd5   :  { %2902 = vmatprep.subr.bf16.mxu0 %v3142_v2  ;;  %v2900_v50 = vpack.c.bf16 %v32_v49, %v31_v47 }
 0xea2   :  { %v775_v52 = vpop.f32.mrb[8].mxu0 }
 0xea3   :  { %v780_v53 = vrot.slane %v775_v52, 6  ;;  %v2676_v54 = vpop.f32.mrb[9].mxu0  ;;  %v3147_v52 = vmov 0  }
 0xea4   :  { %2980 = vset.pattern.permute.xlu0 %v3147_v52  ;;  %2981 = vset.pattern.permute.xlu1 %v3147_v52 }
 0xea5   :  { %v782_v55 = vadd.f32 %v780_v53, %v3234_v13  ;;  %v169_v53 = vld [vmem:[%s3606_s1] sm:$0x3] }
 0xea7   :  { %3022 = vtanh.f32 %v782_v55  ;;  %v2463_v57 = vmul.f32 -1.442695, %v782_v55 }
 0xea9   :  { %3024 = vpow2.f32 %v2463_v57 }
 0xeb1   :  { %v3023_v56 = vpop.eup %3022 }
 0xeb2   :  { %795 = vrot.lane.b32.xlu0 %v3023_v56, %s3145_s12 }
 0xeb3   :  { %v3025_v6 = vpop.eup %3024 }
 0xeb4   :  { %v786_v58 = vadd.f32 1.0, %v3025_v6  ;;  %v3342_v6 = vld [vmem:[%s3602_s2 + $0x4] ss:$0 sm:$0xff] }
 0xeb6   :  { %3026 = vrcp.f32 %v786_v58 }
 0xec0   :  { %v3027_v59 = vpop.eup %3026 }
 0xec1   :  { %v793_v62 = vmul.f32 %v3027_v59, %v791_v10 }
 0xf24   :  { %v796_v60 = vpop.permute.xlu0 %795 }
 0xf25   :  { %v798_v61 = vmul.f32 %v3027_v59, %v796_v60  ;;  %v2452_v60 = vld [vmem:[%s3605_s4 + $0x1] ss:$0 sm:$0xff] }
 0xf27   :  { %800 = vrot.lane.b32.xlu1 %v798_v61, %s3146_s13 }
 0xf99   :  { %v801_v63 = vpop.permute.xlu1 %800 }
 0xf9a   :  { %v803_v0 = vadd.f32 %v801_v63, %v793_v62 }
 0xf9c   :  { %3028 = vtanh.f32 %v803_v0  ;;  %v898_v23 = vrot.slane %v803_v0, 6 }
 0xfa6   :  { %v3029_v1 = vpop.eup %3028 }
 0xfa7   :  { %806 = vrot.lane.b32.xlu0 %v3029_v1, %s3145_s12 }
0x1019   :  { %v807_v3 = vpop.permute.xlu0 %806 }
0x101a   :  { %v809_v4 = vmul.f32 %v3027_v59, %v807_v3 }
0x101c   :  { %v811_v5 = vrot.slane %v809_v4, 2 }
0x101e   :  { %812 = vrot.lane.b32.xlu1 %v811_v5, %s3146_s13 }
0x1090   :  { %v813_v7 = vpop.permute.xlu1 %812 }
0x1091   :  { %2686 = vmatmul.mubr.msk.f32.vlgmr.msra.gmra.mrb[4].mxu1 %vm181_vm3, %v813_v7 }
0x1092   :  { %2707 = vmatprep.mubr.msk.f32.mxu1 %vm3143_vm2, %v3144_v9 }
0x1164   :  { %v882_v8 = vpop.f32.mrb[4].mxu1 }
0x1165   :  { %v887_v11 = vrot.slane %v882_v8, 4  ;;  %v2687_v12 = vpop.f32.mrb[5].mxu1 }
0x1167   :  { %v889_v14 = vadd.f32 %v887_v11, %v3234_v13 }
0x1169   :  { %3030 = vtanh.f32 %v889_v14  ;;  %v2465_v17 = vmul.f32 -1.442695, %v889_v14 }
0x116b   :  { %3032 = vpow2.f32 %v2465_v17 }
0x1173   :  { %v3031_v16 = vpop.eup %3030 }
0x1174   :  { %902 = vrot.lane.b32.xlu0 %v3031_v16, %s3145_s12 }
0x1175   :  { %v3033_v18 = vpop.eup %3032 }
0x1176   :  { %v893_v19 = vadd.f32 1.0, %v3033_v18  ;;  %v137_v18 = vld [vmem:[%s3606_s1] sm:$0xff] }
0x1178   :  { %3034 = vrcp.f32 %v893_v19  ;;  %v33_v19 = vld [vmem:[%s3604_s3 + $0x40] sm:$0xff] }
0x1182   :  { %v3035_v20 = vpop.eup %3034 }
0x1183   :  { %v900_v24 = vmul.f32 %v3035_v20, %v898_v23  ;;  %v36_v23 = vld [vmem:[%s3604_s3 + $0x58] sm:$0xff] }
0x11e6   :  { %v903_v21 = vpop.permute.xlu0 %902 }
0x11e7   :  { %v905_v22 = vmul.f32 %v3035_v20, %v903_v21  ;;  %v35_v21 = vld [vmem:[%s3604_s3 + $0x50] sm:$0xff] }
0x11e9   :  { %907 = vrot.lane.b32.xlu1 %v905_v22, %s3146_s13 }
0x125b   :  { %v908_v25 = vpop.permute.xlu1 %907 }
0x125c   :  { %v910_v26 = vadd.f32 %v908_v25, %v900_v24  ;;  %v3369_v24 = vpack.c.bf16 %v36_v23, %v35_v21 }
0x125e   :  { %3036 = vtanh.f32 %v910_v26  ;;  %v1005_v42 = vrot.slane %v910_v26, 6 }
0x1268   :  { %v3037_v27 = vpop.eup %3036 }
0x1269   :  { %913 = vrot.lane.b32.xlu0 %v3037_v27, %s3145_s12 }
0x12db   :  { %v914_v28 = vpop.permute.xlu0 %913 }
0x12dc   :  { %v916_v29 = vmul.f32 %v3035_v20, %v914_v28  ;;  %v34_v20 = vld [vmem:[%s3604_s3 + $0x48] sm:$0xff] }
0x12dd   :  { %v3363_v22 = vpack.c.bf16 %v34_v20, %v33_v19 }
0x12de   :  { %v918_v15 = vrot.slane %v916_v29, 4 }
0x12e0   :  { %919 = vrot.lane.b32.xlu1 %v918_v15, %s3146_s13  ;;  %v3391_v15 = vld [vmem:[%s3605_s4 + $0x2] ss:$0 sm:$0xff] }
0x1352   :  { %v920_v30 = vpop.permute.xlu1 %919 }
0x1353   :  { %2697 = vmatmul.mubr.msk.f32.vlgmr.msra.gmra.mrb[10].mxu0 %vm181_vm3, %v920_v30 }
0x1354   :  { %2718 = vmatprep.mubr.msk.f32.mxu0 %vm3143_vm2, %v3144_v9  ;;  %2904 = vmatpush3.bf16.msra.mxu0 %v3363_v22 }
0x1355   :  { %2905 = vmatprep.subr.bf16.mxu0 %v3142_v2 }
0x1358   :  { %2907 = vmatpush3.bf16.msra.mxu0 %v3369_v24 }
0x1359   :  { %2914 = vmatprep.subr.bf16.mxu0 %v3142_v2 }
0x1426   :  { %v989_v31 = vpop.f32.mrb[10].mxu0 }
0x1427   :  { %v994_v32 = vrot.slane %v989_v31, 2  ;;  %v2698_v33 = vpop.f32.mrb[11].mxu0 }
0x1429   :  { %v996_v34 = vadd.f32 %v994_v32, %v3234_v13  ;;  %v29_v13 = vld [vmem:[%s3604_s3 + $0x20] sm:$0xff] }
0x142a   :  { %v2897_v48 = vpack.c.bf16 %v30_v46, %v29_v13 }
0x142b   :  { %3038 = vtanh.f32 %v996_v34  ;;  %v2467_v36 = vmul.f32 -1.442695, %v996_v34 }
0x142c   :  { %2898 = vmatpush3.bf16.msra.mxu1 %v2897_v48 }
0x142d   :  { %3040 = vpow2.f32 %v2467_v36  ;;  %2899 = vmatprep.subr.bf16.mxu1 %v3142_v2 }
0x1430   :  { %2901 = vmatpush3.bf16.msra.mxu1 %v2900_v50 }
0x1431   :  { %2908 = vmatprep.subr.bf16.mxu1 %v3142_v2 }
0x1435   :  { %v3039_v35 = vpop.eup %3038 }
0x1436   :  { %1009 = vrot.lane.b32.xlu0 %v3039_v35, %s3145_s12 }
0x1437   :  { %v3041_v37 = vpop.eup %3040 }
0x1438   :  { %v1000_v38 = vadd.f32 1.0, %v3041_v37 }
0x143a   :  { %3042 = vrcp.f32 %v1000_v38 }
0x1444   :  { %v3043_v39 = vpop.eup %3042 }
0x1445   :  { %v1007_v43 = vmul.f32 %v3043_v39, %v1005_v42 }
0x14a8   :  { %v1010_v40 = vpop.permute.xlu0 %1009 }
0x14a9   :  { %v1012_v41 = vmul.f32 %v3043_v39, %v1010_v40 }
0x14ab   :  { %1014 = vrot.lane.b32.xlu1 %v1012_v41, %s3146_s13 }
0x151d   :  { %v1015_v44 = vpop.permute.xlu1 %1014 }
0x151e   :  { %v1017_v45 = vadd.f32 %v1015_v44, %v1007_v43 }
0x1520   :  { %3044 = vtanh.f32 %v1017_v45  ;;  %v1109_v11 = vrot.slane %v1017_v45, 6 }
0x152a   :  { %v3045_v51 = vpop.eup %3044 }
0x152b   :  { %1020 = vrot.lane.b32.xlu0 %v3045_v51, %s3145_s12 }
0x152f   :  { %172 = vperm.xlu0 %2980, %v169_v53  }
0x159d   :  { %v1021_v54 = vpop.permute.xlu0 %1020 }
0x159e   :  { %v1023_v55 = vmul.f32 %v3043_v39, %v1021_v54 }
0x15a0   :  { %v1025_v56 = vrot.slane %v1023_v55, 6 }
0x15a2   :  { %1026 = vrot.lane.b32.xlu1 %v1025_v56, %s3146_s13 }
0x15ae   :  { %v173_v58 = vpop.permute.xlu0 %172 }
0x15af   :  { %v175_v59 = vmul.f32 %v3342_v6, %v173_v58 }
0x15b1   :  { %v180_v61 = vadd.f32 %v2452_v60, %v175_v59 }
0x1614   :  { %v1027_v57 = vpop.permute.xlu1 %1026 }
0x1615   :  { %2708 = vmatmul.mubr.msk.f32.vlgmr.msra.gmra.mrb[6].mxu1 %vm181_vm3, %v1027_v57 }
0x1616   :  { %2729 = vmatprep.mubr.msk.f32.mxu1 %vm3143_vm2, %v3144_v9  ;;  %2910 = vmatpush3.bf16.msra.mxu1 %v3363_v22 }
0x1617   :  { %2911 = vmatprep.subr.bf16.mxu1 %v3142_v2 }
0x161a   :  { %2913 = vmatpush3.bf16.msra.mxu1 %v3369_v24 }
0x161b   :  { %2920 = vmatprep.subr.bf16.mxu1 %v3142_v2 }
0x16e8   :  { %v1096_v10 = vpop.f32.mrb[6].mxu1 }
0x16e9   :  { %v1100_v62 = vadd.f32 %v1096_v10, %v180_v61  ;;  %v2709_v63 = vpop.f32.mrb[7].mxu1 }
0x16eb   :  { %3046 = vtanh.f32 %v1100_v62  ;;  %v2469_v1 = vmul.f32 -1.442695, %v1100_v62 }
0x16ed   :  { %3048 = vpow2.f32 %v2469_v1 }
0x16f5   :  { %v3047_v0 = vpop.eup %3046 }
0x16f6   :  { %1113 = vrot.lane.b32.xlu1 %v3047_v0, %s3145_s12 }
0x16f7   :  { %v3049_v3 = vpop.eup %3048 }
0x16f8   :  { %v1104_v4 = vadd.f32 1.0, %v3049_v3 }
0x16fa   :  { %3050 = vrcp.f32 %v1104_v4 }
0x1704   :  { %v3051_v5 = vpop.eup %3050 }
0x1705   :  { %v1111_v12 = vmul.f32 %v3051_v5, %v1109_v11 }
0x1768   :  { %v1114_v7 = vpop.permute.xlu1 %1113 }
0x1769   :  { %v1116_v8 = vmul.f32 %v3051_v5, %v1114_v7 }
0x176b   :  { %1118 = vrot.lane.b32.xlu1 %v1116_v8, %s3146_s13 }
0x17dd   :  { %v1119_v14 = vpop.permute.xlu1 %1118 }
0x17de   :  { %v1121_v16 = vadd.f32 %v1119_v14, %v1111_v12 }
0x17e0   :  { %3052 = vtanh.f32 %v1121_v16  ;;  %v1218_v42 = vrot.slane %v1121_v16, 6 }
0x17ea   :  { %v3053_v17 = vpop.eup %3052 }
0x17eb   :  { %1124 = vrot.lane.b32.xlu0 %v3053_v17, %s3145_s12 }
0x17ef   :  { %142 = vperm.xlu0 %2980, %v137_v18  }
0x185d   :  { %v1125_v25 = vpop.permute.xlu0 %1124 }
0x185e   :  { %v1127_v26 = vmul.f32 %v3051_v5, %v1125_v25 }
0x1860   :  { %1129 = vrot.lane.b32.xlu1 %v1127_v26, %s3146_s13 }
0x186e   :  { %v143_v28 = vpop.permute.xlu0 %142 }
0x186f   :  { %v159_v29 = vmul.f32 %v3342_v6, %v143_v28 }
0x1871   :  { %v3394_v31 = vadd.f32 %v3391_v15, %v159_v29  ;;  %v138_v29 = vld [vmem:[%s3606_s1 + $0x8] sm:$0xff] }
0x18d2   :  { %v1130_v27 = vpop.permute.xlu1 %1129 }
0x18d3   :  { %1133 = vst.msk [vmem:[#allocation2] sm:$0x3] %vm1132_vm4, %v1130_v27  ;;  %2719 = vmatmul.mubr.msk.f32.vlgmr.msra.gmra.mrb[12].mxu0 %vm181_vm3, %v1130_v27 }
0x18d4   :  { %2916 = vmatpush3.bf16.msra.mxu0 %v3363_v22  ;;  %2740 = vmatprep.mubr.msk.f32.mxu0 %vm3143_vm2, %v3144_v9 }
0x18d5   :  { %2917 = vmatprep.subr.bf16.mxu0 %v3142_v2 }
0x18d8   :  { %2919 = vmatpush3.bf16.msra.mxu0 %v3369_v24 }
0x18d9   :  { %2926 = vmatprep.subr.bf16.mxu0 %v3142_v2 }
0x19a6   :  { %v1202_v30 = vpop.f32.mrb[12].mxu0 }
0x19a7   :  { %v1207_v32 = vrot.slane %v1202_v30, 6  ;;  %v2720_v33 = vpop.f32.mrb[13].mxu0 }
0x19a9   :  { %v1209_v34 = vadd.f32 %v1207_v32, %v3394_v31 }
0x19ab   :  { %3054 = vtanh.f32 %v1209_v34  ;;  %v2471_v36 = vmul.f32 -1.442695, %v1209_v34 }
0x19ad   :  { %3056 = vpow2.f32 %v2471_v36 }
0x19b5   :  { %v3055_v35 = vpop.eup %3054 }
0x19b6   :  { %1222 = vrot.lane.b32.xlu1 %v3055_v35, %s3145_s12 }
0x19b7   :  { %v3057_v37 = vpop.eup %3056 }
0x19b8   :  { %v1213_v38 = vadd.f32 1.0, %v3057_v37 }
0x19ba   :  { %3058 = vrcp.f32 %v1213_v38 }
0x19c4   :  { %v3059_v39 = vpop.eup %3058 }
0x19c5   :  { %v1220_v43 = vmul.f32 %v3059_v39, %v1218_v42 }
0x1a28   :  { %v1223_v40 = vpop.permute.xlu1 %1222 }
0x1a29   :  { %v1225_v41 = vmul.f32 %v3059_v39, %v1223_v40 }
0x1a2b   :  { %1227 = vrot.lane.b32.xlu0 %v1225_v41, %s3146_s13 }
0x1a9d   :  { %v1228_v44 = vpop.permute.xlu0 %1227 }
0x1a9e   :  { %v1230_v45 = vadd.f32 %v1228_v44, %v1220_v43 }
0x1aa0   :  { %3060 = vtanh.f32 %v1230_v45  ;;  %v1330_v61 = vrot.slane %v1230_v45, 6 }
0x1aaa   :  { %v3061_v13 = vpop.eup %3060 }
0x1aab   :  { %1233 = vrot.lane.b32.xlu1 %v3061_v13, %s3145_s12 }
0x1b1d   :  { %v1234_v46 = vpop.permute.xlu1 %1233 }
0x1b1e   :  { %v3400_v47 = vmul.f32 %v3059_v39, %v1234_v46 }
0x1b20   :  { %v1243_v48 = vrot.slane %v3400_v47, 2 }
0x1b22   :  { %1244 = vrot.lane.b32.xlu0 %v1243_v48, %s3146_s13 }
0x1b94   :  { %v1245_v49 = vpop.permute.xlu0 %1244 }
0x1b95   :  { %2730 = vmatmul.mubr.msk.f32.vlgmr.msra.gmra.mrb[8].mxu1 %vm181_vm3, %v1245_v49 }
0x1b96   :  { %2922 = vmatpush3.bf16.msra.mxu1 %v3363_v22  ;;  %2751 = vmatprep.mubr.msk.f32.mxu1 %vm3143_vm2, %v3144_v9 }
0x1b97   :  { %2923 = vmatprep.subr.bf16.mxu1 %v3142_v2 }
0x1b9a   :  { %2925 = vmatpush3.bf16.msra.mxu1 %v3369_v24 }
0x1b9b   :  { %2932 = vmatprep.subr.bf16.mxu1 %v3142_v2 }
0x1c68   :  { %v1314_v50 = vpop.f32.mrb[8].mxu1 }
0x1c69   :  { %v1319_v51 = vrot.slane %v1314_v50, 4  ;;  %v2731_v52 = vpop.f32.mrb[9].mxu1 }
0x1c6b   :  { %v1321_v53 = vadd.f32 %v1319_v51, %v3394_v31 }
0x1c6d   :  { %3062 = vtanh.f32 %v1321_v53  ;;  %v2473_v55 = vmul.f32 -1.442695, %v1321_v53 }
0x1c6f   :  { %3064 = vpow2.f32 %v2473_v55 }
0x1c77   :  { %v3063_v54 = vpop.eup %3062 }
0x1c78   :  { %1334 = vrot.lane.b32.xlu1 %v3063_v54, %s3145_s12 }
0x1c79   :  { %v3065_v56 = vpop.eup %3064 }
0x1c7a   :  { %v1325_v57 = vadd.f32 1.0, %v3065_v56 }
0x1c7c   :  { %3066 = vrcp.f32 %v1325_v57 }
0x1c86   :  { %v3067_v58 = vpop.eup %3066 }
0x1c87   :  { %v1332_v10 = vmul.f32 %v3067_v58, %v1330_v61 }
0x1cea   :  { %v1335_v59 = vpop.permute.xlu1 %1334 }
0x1ceb   :  { %v1337_v60 = vmul.f32 %v3067_v58, %v1335_v59 }
0x1ced   :  { %1339 = vrot.lane.b32.xlu0 %v1337_v60, %s3146_s13 }
0x1d5f   :  { %v1340_v62 = vpop.permute.xlu0 %1339 }
0x1d60   :  { %v1342_v63 = vadd.f32 %v1340_v62, %v1332_v10 }
0x1d62   :  { %3068 = vtanh.f32 %v1342_v63  ;;  %v1442_v23 = vrot.slane %v1342_v63, 6 }
0x1d6c   :  { %v3069_v0 = vpop.eup %3068 }
0x1d6d   :  { %1345 = vrot.lane.b32.xlu1 %v3069_v0, %s3145_s12 }
0x1ddf   :  { %v1346_v1 = vpop.permute.xlu1 %1345 }
0x1de0   :  { %v3415_v3 = vmul.f32 %v3067_v58, %v1346_v1 }
0x1de2   :  { %v1355_v4 = vrot.slane %v3415_v3, 4 }
0x1de4   :  { %1356 = vrot.lane.b32.xlu0 %v1355_v4, %s3146_s13 }
0x1e56   :  { %v1357_v5 = vpop.permute.xlu0 %1356 }
0x1e57   :  { %2741 = vmatmul.mubr.msk.f32.vlgmr.msra.gmra.mrb[14].mxu0 %vm181_vm3, %v1357_v5 }
0x1e58   :  { %2928 = vmatpush3.bf16.msra.mxu0 %v3363_v22  ;;  %2762 = vmatprep.mubr.msk.f32.mxu0 %vm3143_vm2, %v3144_v9 }
0x1e59   :  { %2929 = vmatprep.subr.bf16.mxu0 %v3142_v2 }
0x1e5c   :  { %2931 = vmatpush3.bf16.msra.mxu0 %v3369_v24 }
0x1e5d   :  { %2938 = vmatprep.subr.bf16.mxu0 %v3142_v2 }
0x1f2a   :  { %v1426_v7 = vpop.f32.mrb[14].mxu0 }
0x1f2b   :  { %v1431_v8 = vrot.slane %v1426_v7, 2  ;;  %v2742_v11 = vpop.f32.mrb[15].mxu0 }
0x1f2d   :  { %v1433_v12 = vadd.f32 %v1431_v8, %v3394_v31 }
0x1f2f   :  { %3070 = vtanh.f32 %v1433_v12  ;;  %v2475_v16 = vmul.f32 -1.442695, %v1433_v12 }
0x1f31   :  { %3072 = vpow2.f32 %v2475_v16 }
0x1f39   :  { %v3071_v14 = vpop.eup %3070 }
0x1f3a   :  { %1446 = vrot.lane.b32.xlu1 %v3071_v14, %s3145_s12 }
0x1f3b   :  { %v3073_v17 = vpop.eup %3072 }
0x1f3c   :  { %v1437_v18 = vadd.f32 1.0, %v3073_v17 }
0x1f3e   :  { %3074 = vrcp.f32 %v1437_v18 }
0x1f48   :  { %v3075_v19 = vpop.eup %3074 }
0x1f49   :  { %v1444_v25 = vmul.f32 %v3075_v19, %v1442_v23 }
0x1fac   :  { %v1447_v20 = vpop.permute.xlu1 %1446 }
0x1fad   :  { %v1449_v21 = vmul.f32 %v3075_v19, %v1447_v20 }
0x1faf   :  { %1451 = vrot.lane.b32.xlu0 %v1449_v21, %s3146_s13 }
0x2021   :  { %v1452_v26 = vpop.permute.xlu0 %1451 }
0x2022   :  { %v1454_v27 = vadd.f32 %v1452_v26, %v1444_v25 }
0x2024   :  { %3076 = vtanh.f32 %v1454_v27  ;;  %v1551_v46 = vrot.slane %v1454_v27, 6 }
0x202e   :  { %v3077_v28 = vpop.eup %3076 }
0x202f   :  { %1457 = vrot.lane.b32.xlu1 %v3077_v28, %s3145_s12 }
0x2033   :  { %147 = vperm.xlu1 %2981, %v138_v29  }
0x20a1   :  { %v1458_v30 = vpop.permute.xlu1 %1457 }
0x20a2   :  { %v3433_v31 = vmul.f32 %v3075_v19, %v1458_v30 }
0x20a4   :  { %v1467_v32 = vrot.slane %v3433_v31, 6 }
0x20a6   :  { %1468 = vrot.lane.b32.xlu0 %v1467_v32, %s3146_s13 }
0x20b2   :  { %v148_v34 = vpop.permute.xlu1 %147 }
0x20b3   :  { %v160_v35 = vmul.f32 %v3342_v6, %v148_v34 }
0x20b5   :  { %v3446_v36 = vadd.f32 %v3391_v15, %v160_v35 }
0x2118   :  { %v1469_v33 = vpop.permute.xlu0 %1468 }
0x2119   :  { %2752 = vmatmul.mubr.msk.f32.vlgmr.msra.gmra.mrb[10].mxu1 %vm181_vm3, %v1469_v33 }
0x211a   :  { %2934 = vmatpush3.bf16.msra.mxu1 %v3363_v22  ;;  %2773 = vmatprep.mubr.msk.f32.mxu1 %vm3143_vm2, %v3144_v9 }
0x211b   :  { %2935 = vmatprep.subr.bf16.mxu1 %v3142_v2 }
0x211e   :  { %2937 = vmatpush3.bf16.msra.mxu1 %v3369_v24 }
0x211f   :  { %2944 = vmatprep.subr.bf16.mxu1 %v3142_v2 }
0x21ec   :  { %v1538_v37 = vpop.f32.mrb[10].mxu1 }
0x21ed   :  { %v1542_v38 = vadd.f32 %v1538_v37, %v3446_v36  ;;  %v2753_v39 = vpop.f32.mrb[11].mxu1 }
0x21ef   :  { %3078 = vtanh.f32 %v1542_v38  ;;  %v2477_v41 = vmul.f32 -1.442695, %v1542_v38 }
0x21f1   :  { %3080 = vpow2.f32 %v2477_v41 }
0x21f9   :  { %v3079_v40 = vpop.eup %3078 }
0x21fa   :  { %1555 = vrot.lane.b32.xlu0 %v3079_v40, %s3145_s12 }
0x21fb   :  { %v3081_v42 = vpop.eup %3080 }
0x21fc   :  { %v1546_v43 = vadd.f32 1.0, %v3081_v42 }
0x21fe   :  { %3082 = vrcp.f32 %v1546_v43 }
0x2208   :  { %v3083_v44 = vpop.eup %3082 }
0x2209   :  { %v1553_v48 = vmul.f32 %v3083_v44, %v1551_v46 }
0x226c   :  { %v1556_v45 = vpop.permute.xlu0 %1555 }
0x226d   :  { %v1558_v13 = vmul.f32 %v3083_v44, %v1556_v45 }
0x226f   :  { %1560 = vrot.lane.b32.xlu1 %v1558_v13, %s3146_s13 }
0x22e1   :  { %v1561_v49 = vpop.permute.xlu1 %1560 }
0x22e2   :  { %v1563_v50 = vadd.f32 %v1561_v49, %v1553_v48 }
0x22e4   :  { %3084 = vtanh.f32 %v1563_v50  ;;  %v1659_v1 = vrot.slane %v1563_v50, 6 }
0x22ee   :  { %v3085_v51 = vpop.eup %3084 }
0x22ef   :  { %1566 = vrot.lane.b32.xlu0 %v3085_v51, %s3145_s12 }
0x2361   :  { %v1567_v52 = vpop.permute.xlu0 %1566 }
0x2362   :  { %v1569_v53 = vmul.f32 %v3083_v44, %v1567_v52 }
0x2364   :  { %1571 = vrot.lane.b32.xlu1 %v1569_v53, %s3146_s13 }
0x23d6   :  { %v1572_v54 = vpop.permute.xlu1 %1571 }
0x23d7   :  { %1574 = vst.msk [vmem:[#allocation2 + $0x8] sm:$0x3] %vm1132_vm4, %v1572_v54  ;;  %2763 = vmatmul.mubr.msk.f32.vlgmr.msra.gmra.mrb[16].mxu0 %vm181_vm3, %v1572_v54 }
0x23d8   :  { %2940 = vmatpush3.bf16.msra.mxu0 %v3363_v22  ;;  %2784 = vmatprep.mubr.msk.f32.mxu0 %vm3143_vm2, %v3144_v9 }
0x23d9   :  { %2941 = vmatprep.subr.bf16.mxu0 %v3142_v2 }
0x23dc   :  { %2943 = vmatpush3.bf16.msra.mxu0 %v3369_v24 }
0x23dd   :  { %2950 = vmatprep.subr.bf16.mxu0 %v3142_v2 }
0x24aa   :  { %v1643_v55 = vpop.f32.mrb[16].mxu0 }
0x24ab   :  { %v1648_v56 = vrot.slane %v1643_v55, 6  ;;  %v2764_v57 = vpop.f32.mrb[17].mxu0 }
0x24ad   :  { %v1650_v58 = vadd.f32 %v1648_v56, %v3446_v36  ;;  %v139_v56 = vld [vmem:[%s3606_s1 + $0x10] sm:$0xff] }
0x24af   :  { %3086 = vtanh.f32 %v1650_v58  ;;  %v2479_v60 = vmul.f32 -1.442695, %v1650_v58 }
0x24b1   :  { %3088 = vpow2.f32 %v2479_v60 }
0x24b9   :  { %v3087_v59 = vpop.eup %3086 }
0x24ba   :  { %1663 = vrot.lane.b32.xlu0 %v3087_v59, %s3145_s12 }
0x24bb   :  { %v3089_v61 = vpop.eup %3088 }
0x24bc   :  { %v1654_v10 = vadd.f32 1.0, %v3089_v61 }
0x24be   :  { %3090 = vrcp.f32 %v1654_v10 }
0x24c8   :  { %v3091_v62 = vpop.eup %3090 }
0x24c9   :  { %v1661_v4 = vmul.f32 %v3091_v62, %v1659_v1 }
0x252c   :  { %v1664_v63 = vpop.permute.xlu0 %1663 }
0x252d   :  { %v1666_v0 = vmul.f32 %v3091_v62, %v1664_v63 }
0x252f   :  { %1668 = vrot.lane.b32.xlu1 %v1666_v0, %s3146_s13 }
0x25a1   :  { %v1669_v5 = vpop.permute.xlu1 %1668 }
0x25a2   :  { %v1671_v7 = vadd.f32 %v1669_v5, %v1661_v4 }
0x25a4   :  { %3092 = vtanh.f32 %v1671_v7  ;;  %v1770_v30 = vrot.slane %v1671_v7, 6 }
0x25ae   :  { %v3093_v8 = vpop.eup %3092 }
0x25af   :  { %1674 = vrot.lane.b32.xlu0 %v3093_v8, %s3145_s12 }
0x2621   :  { %v1675_v11 = vpop.permute.xlu0 %1674 }
0x2622   :  { %v3465_v12 = vmul.f32 %v3091_v62, %v1675_v11 }
0x2624   :  { %v1683_v14 = vrot.slane %v3465_v12, 2 }
0x2626   :  { %1684 = vrot.lane.b32.xlu1 %v1683_v14, %s3146_s13 }
0x2698   :  { %v1685_v16 = vpop.permute.xlu1 %1684 }
0x2699   :  { %2774 = vmatmul.mubr.msk.f32.vlgmr.msra.gmra.mrb[12].mxu1 %vm181_vm3, %v1685_v16 }
0x269a   :  { %2946 = vmatpush3.bf16.msra.mxu1 %v3363_v22  ;;  %2795 = vmatprep.mubr.msk.f32.mxu1 %vm3143_vm2, %v3144_v9 }
0x269b   :  { %2947 = vmatprep.subr.bf16.mxu1 %v3142_v2 }
0x269e   :  { %2949 = vmatpush3.bf16.msra.mxu1 %v3369_v24 }
0x269f   :  { %2956 = vmatprep.subr.bf16.mxu1 %v3142_v2 }
0x276c   :  { %v1754_v17 = vpop.f32.mrb[12].mxu1 }
0x276d   :  { %v1759_v18 = vrot.slane %v1754_v17, 4  ;;  %v2775_v19 = vpop.f32.mrb[13].mxu1 }
0x276f   :  { %v1761_v20 = vadd.f32 %v1759_v18, %v3446_v36 }
0x2771   :  { %3094 = vtanh.f32 %v1761_v20  ;;  %v2481_v23 = vmul.f32 -1.442695, %v1761_v20 }
0x2773   :  { %3096 = vpow2.f32 %v2481_v23 }
0x277b   :  { %v3095_v21 = vpop.eup %3094 }
0x277c   :  { %1774 = vrot.lane.b32.xlu0 %v3095_v21, %s3145_s12 }
0x277d   :  { %v3097_v25 = vpop.eup %3096 }
0x277e   :  { %v1765_v26 = vadd.f32 1.0, %v3097_v25 }
0x2780   :  { %3098 = vrcp.f32 %v1765_v26 }
0x278a   :  { %v3099_v27 = vpop.eup %3098 }
0x278b   :  { %v1772_v32 = vmul.f32 %v3099_v27, %v1770_v30 }
0x27ee   :  { %v1775_v28 = vpop.permute.xlu0 %1774 }
0x27ef   :  { %v1777_v29 = vmul.f32 %v3099_v27, %v1775_v28 }
0x27f1   :  { %1779 = vrot.lane.b32.xlu1 %v1777_v29, %s3146_s13 }
0x2863   :  { %v1780_v33 = vpop.permute.xlu1 %1779 }
0x2864   :  { %v1782_v34 = vadd.f32 %v1780_v33, %v1772_v32 }
0x2866   :  { %3100 = vtanh.f32 %v1782_v34  ;;  %v1881_v52 = vrot.slane %v1782_v34, 6 }
0x2870   :  { %v3101_v35 = vpop.eup %3100 }
0x2871   :  { %1785 = vrot.lane.b32.xlu0 %v3101_v35, %s3145_s12 }
0x28e3   :  { %v1786_v37 = vpop.permute.xlu0 %1785 }
0x28e4   :  { %v3480_v38 = vmul.f32 %v3099_v27, %v1786_v37 }
0x28e6   :  { %v1794_v39 = vrot.slane %v3480_v38, 4 }
0x28e8   :  { %1795 = vrot.lane.b32.xlu1 %v1794_v39, %s3146_s13 }
0x295a   :  { %v1796_v40 = vpop.permute.xlu1 %1795 }
0x295b   :  { %2785 = vmatmul.mubr.msk.f32.vlgmr.msra.gmra.mrb[18].mxu0 %vm181_vm3, %v1796_v40 }
0x295c   :  { %2952 = vmatpush3.bf16.msra.mxu0 %v3363_v22  ;;  %2806 = vmatprep.mubr.msk.f32.mxu0 %vm3143_vm2, %v3144_v9 }
0x295d   :  { %2953 = vmatprep.subr.bf16.mxu0 %v3142_v2 }
0x2960   :  { %2955 = vmatpush3.bf16.msra.mxu0 %v3369_v24 }
0x2961   :  { %2962 = vmatprep.subr.bf16.mxu0 %v3142_v2 }
0x2a2e   :  { %v1865_v41 = vpop.f32.mrb[18].mxu0 }
0x2a2f   :  { %v1870_v42 = vrot.slane %v1865_v41, 2  ;;  %v2786_v43 = vpop.f32.mrb[19].mxu0 }
0x2a31   :  { %v1872_v44 = vadd.f32 %v1870_v42, %v3446_v36 }
0x2a33   :  { %3102 = vtanh.f32 %v1872_v44  ;;  %v2483_v13 = vmul.f32 -1.442695, %v1872_v44 }
0x2a35   :  { %3104 = vpow2.f32 %v2483_v13 }
0x2a3d   :  { %v3103_v45 = vpop.eup %3102 }
0x2a3e   :  { %1885 = vrot.lane.b32.xlu0 %v3103_v45, %s3145_s12 }
0x2a3f   :  { %v3105_v46 = vpop.eup %3104 }
0x2a40   :  { %v1876_v48 = vadd.f32 1.0, %v3105_v46 }
0x2a42   :  { %3106 = vrcp.f32 %v1876_v48 }
0x2a4c   :  { %v3107_v49 = vpop.eup %3106 }
0x2a4d   :  { %v1883_v53 = vmul.f32 %v3107_v49, %v1881_v52 }
0x2ab0   :  { %v1886_v50 = vpop.permute.xlu0 %1885 }
0x2ab1   :  { %v1888_v51 = vmul.f32 %v3107_v49, %v1886_v50 }
0x2ab3   :  { %1890 = vrot.lane.b32.xlu1 %v1888_v51, %s3146_s13 }
0x2b25   :  { %v1891_v54 = vpop.permute.xlu1 %1890 }
0x2b26   :  { %v1893_v55 = vadd.f32 %v1891_v54, %v1883_v53 }
0x2b28   :  { %3108 = vtanh.f32 %v1893_v55 }
0x2b32   :  { %v3109_v36 = vpop.eup %3108 }
0x2b33   :  { %1896 = vrot.lane.b32.xlu0 %v3109_v36, %s3145_s12 }
0x2b37   :  { %152 = vperm.xlu0 %2980, %v139_v56  }
0x2ba5   :  { %v1897_v57 = vpop.permute.xlu0 %1896 }
0x2ba6   :  { %v3498_v58 = vmul.f32 %v3107_v49, %v1897_v57 }
0x2ba8   :  { %v1905_v59 = vrot.slane %v3498_v58, 6 }
0x2baa   :  { %1906 = vrot.lane.b32.xlu1 %v1905_v59, %s3146_s13 }
0x2bb6   :  { %v153_v61 = vpop.permute.xlu0 %152 }
0x2bb7   :  { %v161_v10 = vmul.f32 %v3342_v6, %v153_v61  ;;  %v1989_v6 = vrot.slane %v1893_v55, 6 }
0x2bb9   :  { %v3511_v62 = vadd.f32 %v3391_v15, %v161_v10 }
0x2c1c   :  { %v1907_v60 = vpop.permute.xlu1 %1906 }
0x2c1d   :  { %2796 = vmatmul.mubr.msk.f32.vlgmr.msra.gmra.mrb[14].mxu1 %vm181_vm3, %v1907_v60 }
0x2c1e   :  { %2958 = vmatpush3.bf16.msra.mxu1 %v3363_v22  ;;  %2817 = vmatprep.mubr.msk.f32.mxu1 %vm3143_vm2, %v3144_v9 }
0x2c1f   :  { %2959 = vmatprep.subr.bf16.mxu1 %v3142_v2 }
0x2c22   :  { %2961 = vmatpush3.bf16.msra.mxu1 %v3369_v24 }
0x2c23   :  { %2968 = vmatprep.subr.bf16.mxu1 %v3142_v2 }
0x2cf0   :  { %v1976_v63 = vpop.f32.mrb[14].mxu1 }
0x2cf1   :  { %v1980_v0 = vadd.f32 %v1976_v63, %v3511_v62  ;;  %v2797_v1 = vpop.f32.mrb[15].mxu1 }
0x2cf3   :  { %3110 = vtanh.f32 %v1980_v0  ;;  %v2485_v5 = vmul.f32 -1.442695, %v1980_v0 }
0x2cf5   :  { %3112 = vpow2.f32 %v2485_v5 }
0x2cfd   :  { %v3111_v4 = vpop.eup %3110 }
0x2cfe   :  { %1993 = vrot.lane.b32.xlu1 %v3111_v4, %s3145_s12 }
0x2cff   :  { %v3113_v7 = vpop.eup %3112 }
0x2d00   :  { %v1984_v8 = vadd.f32 1.0, %v3113_v7 }
0x2d02   :  { %3114 = vrcp.f32 %v1984_v8 }
0x2d0c   :  { %v3115_v11 = vpop.eup %3114 }
0x2d0d   :  { %v1991_v15 = vmul.f32 %v3115_v11, %v1989_v6 }
0x2d70   :  { %v1994_v14 = vpop.permute.xlu1 %1993 }
0x2d71   :  { %v1996_v16 = vmul.f32 %v3115_v11, %v1994_v14 }
0x2d73   :  { %1998 = vrot.lane.b32.xlu0 %v1996_v16, %s3146_s13 }
0x2de5   :  { %v1999_v17 = vpop.permute.xlu0 %1998 }
0x2de6   :  { %v2001_v18 = vadd.f32 %v1999_v17, %v1991_v15 }
0x2de8   :  { %3116 = vtanh.f32 %v2001_v18 }
0x2df2   :  { %v3117_v19 = vpop.eup %3116 }
0x2df3   :  { %2004 = vrot.lane.b32.xlu1 %v3117_v19, %s3145_s12 }
0x2e65   :  { %v2005_v20 = vpop.permute.xlu1 %2004 }
0x2e66   :  { %v2007_v21 = vmul.f32 %v3115_v11, %v2005_v20 }
0x2e68   :  { %2009 = vrot.lane.b32.xlu0 %v2007_v21, %s3146_s13 }
0x2eda   :  { %v2010_v23 = vpop.permute.xlu0 %2009 }
0x2edb   :  { %2012 = vst.msk [vmem:[#allocation2 + $0x10] sm:$0x3] %vm1132_vm4, %v2010_v23  ;;  %2807 = vmatmul.mubr.msk.f32.vlgmr.msra.gmra.mrb[20].mxu0 %vm181_vm3, %v2010_v23  ;;  %v40_v23 = vld [vmem:[%s3607_s5] sm:$0xff] }
0x2edc   :  { %2964 = vmatpush3.bf16.msra.mxu0 %v3363_v22  ;;  %2828 = vmatprep.mubr.msk.f32.mxu0 %vm3143_vm2, %v3144_v9 }
0x2edd   :  { %2965 = vmatprep.subr.bf16.mxu0 %v3142_v2 }
0x2ee0   :  { %2967 = vmatpush3.bf16.msra.mxu0 %v3369_v24  ;;  %v2097_v24 = vrot.slane %v2001_v18, 6 }
0x2fae   :  { %v2081_v25 = vpop.f32.mrb[20].mxu0 }
0x2faf   :  { %v2086_v26 = vrot.slane %v2081_v25, 6  ;;  %v2808_v27 = vpop.f32.mrb[21].mxu0 }
0x2fb1   :  { %v2088_v28 = vadd.f32 %v2086_v26, %v3511_v62  ;;  %v43_v26 = vld [vmem:[%s3607_s5 + $0x18] sm:$0xff] }
0x2fb3   :  { %3118 = vtanh.f32 %v2088_v28  ;;  %v2487_v30 = vmul.f32 -1.442695, %v2088_v28 }
0x2fb5   :  { %3120 = vpow2.f32 %v2487_v30 }
0x2fbd   :  { %v3119_v29 = vpop.eup %3118 }
0x2fbe   :  { %2101 = vrot.lane.b32.xlu1 %v3119_v29, %s3145_s12 }
0x2fbf   :  { %v3121_v32 = vpop.eup %3120 }
0x2fc0   :  { %v2092_v22 = vadd.f32 1.0, %v3121_v32 }
0x2fc2   :  { %3122 = vrcp.f32 %v2092_v22 }
0x2fcc   :  { %v3123_v33 = vpop.eup %3122 }
0x2fcd   :  { %v2099_v37 = vmul.f32 %v3123_v33, %v2097_v24 }
0x3030   :  { %v2102_v34 = vpop.permute.xlu1 %2101 }
0x3031   :  { %v2104_v35 = vmul.f32 %v3123_v33, %v2102_v34 }
0x3033   :  { %2106 = vrot.lane.b32.xlu0 %v2104_v35, %s3146_s13 }
0x30a5   :  { %v2107_v39 = vpop.permute.xlu0 %2106 }
0x30a6   :  { %v2109_v40 = vadd.f32 %v2107_v39, %v2099_v37  ;;  %v2492_v39 = vld [vmem:[%s3607_s5 + $0x20] ss:$0 sm:$0xff] }
0x30a8   :  { %3124 = vtanh.f32 %v2109_v40  ;;  %v2208_v56 = vrot.slane %v2109_v40, 6 }
0x30b2   :  { %v3125_v41 = vpop.eup %3124 }
0x30b3   :  { %2112 = vrot.lane.b32.xlu1 %v3125_v41, %s3145_s12 }
0x3125   :  { %v2113_v42 = vpop.permute.xlu1 %2112 }
0x3126   :  { %v2115_v43 = vmul.f32 %v3123_v33, %v2113_v42 }
0x3128   :  { %v2121_v44 = vrot.slane %v2115_v43, 2 }
0x312a   :  { %2122 = vrot.lane.b32.xlu0 %v2121_v44, %s3146_s13 }
0x319c   :  { %v2123_v45 = vpop.permute.xlu0 %2122 }
0x319d   :  { %2818 = vmatmul.mubr.msk.f32.vlgmr.msra.gmra.mrb[16].mxu1 %vm181_vm3, %v2123_v45 }
0x319e   :  { %2839 = vmatprep.mubr.msk.f32.mxu1 %vm3143_vm2, %v3144_v9 }
0x3270   :  { %v2192_v13 = vpop.f32.mrb[16].mxu1 }
0x3271   :  { %v2197_v46 = vrot.slane %v2192_v13, 4  ;;  %v2819_v48 = vpop.f32.mrb[17].mxu1 }
0x3273   :  { %v2199_v49 = vadd.f32 %v2197_v46, %v3511_v62 }
0x3275   :  { %3126 = vtanh.f32 %v2199_v49  ;;  %v2489_v51 = vmul.f32 -1.442695, %v2199_v49 }
0x3277   :  { %3128 = vpow2.f32 %v2489_v51 }
0x327f   :  { %v3127_v50 = vpop.eup %3126 }
0x3280   :  { %2212 = vrot.lane.b32.xlu1 %v3127_v50, %s3145_s12 }
0x3281   :  { %v3129_v52 = vpop.eup %3128 }
0x3282   :  { %v2203_v53 = vadd.f32 1.0, %v3129_v52 }
0x3284   :  { %3130 = vrcp.f32 %v2203_v53 }
0x328e   :  { %v3131_v54 = vpop.eup %3130 }
0x328f   :  { %v2210_v57 = vmul.f32 %v3131_v54, %v2208_v56 }
0x32f2   :  { %v2213_v55 = vpop.permute.xlu1 %2212 }
0x32f3   :  { %v2215_v36 = vmul.f32 %v3131_v54, %v2213_v55 }
0x32f5   :  { %2217 = vrot.lane.b32.xlu0 %v2215_v36, %s3146_s13 }
0x3367   :  { %v2218_v59 = vpop.permute.xlu0 %2217 }
0x3368   :  { %v2220_v60 = vadd.f32 %v2218_v59, %v2210_v57 }
0x336a   :  { %3132 = vtanh.f32 %v2220_v60 }
0x3374   :  { %v3133_v61 = vpop.eup %3132 }
0x3375   :  { %2223 = vrot.lane.b32.xlu1 %v3133_v61, %s3145_s12 }
0x33e7   :  { %v2224_v10 = vpop.permute.xlu1 %2223 }
0x33e8   :  { %v2226_v63 = vmul.f32 %v3131_v54, %v2224_v10 }
0x33ea   :  { %v2232_v0 = vrot.slane %v2226_v63, 4 }
0x33ec   :  { %2233 = vrot.lane.b32.xlu0 %v2232_v0, %s3146_s13 }
0x345e   :  { %v2234_v1 = vpop.permute.xlu0 %2233 }
0x345f   :  { %2829 = vmatmul.mubr.msk.f32.vlgmr.msra.gmra.mrb[22].mxu0 %vm181_vm3, %v2234_v1 }
0x3532   :  { %v2303_v4 = vpop.f32.mrb[22].mxu0 }
0x3533   :  { %v2308_v5 = vrot.slane %v2303_v4, 2  ;;  %v2830_v7 = vpop.f32.mrb[23].mxu0 }
0x3535   :  { %v2310_v8 = vadd.f32 %v2308_v5, %v3511_v62  ;;  %v2319_v62 = vrot.slane %v2220_v60, 6 }
0x3537   :  { %3134 = vtanh.f32 %v2310_v8  ;;  %v2491_v14 = vmul.f32 -1.442695, %v2310_v8 }
0x3539   :  { %3136 = vpow2.f32 %v2491_v14 }
0x3541   :  { %v3135_v11 = vpop.eup %3134 }
0x3542   :  { %2323 = vrot.lane.b32.xlu1 %v3135_v11, %s3145_s12 }
0x3543   :  { %v3137_v16 = vpop.eup %3136 }
0x3544   :  { %v2314_v6 = vadd.f32 1.0, %v3137_v16 }
0x3546   :  { %3138 = vrcp.f32 %v2314_v6 }
0x3550   :  { %v3139_v15 = vpop.eup %3138 }
0x3551   :  { %v2321_v19 = vmul.f32 %v3139_v15, %v2319_v62 }
0x35b4   :  { %v2324_v17 = vpop.permute.xlu1 %2323 }
0x35b5   :  { %v2326_v18 = vmul.f32 %v3139_v15, %v2324_v17 }
0x35b7   :  { %2328 = vrot.lane.b32.xlu0 %v2326_v18, %s3146_s13 }
0x35bb   :  { %1238 = vrot.lane.b32.xlu0 %v3400_v47, %s3146_s13  ;;  %v41_v47 = vld [vmem:[%s3607_s5 + $0x8] sm:$0xff] }
0x35bc   :  { %v2969_v25 = vpack.c.bf16 %v41_v47, %v40_v23 }
0x35be   :  { %2970 = vmatpush3.bf16.msra.mxu1 %v2969_v25 }
0x35bf   :  { %1462 = vrot.lane.b32.xlu0 %v3433_v31, %s3146_s13  ;;  %2971 = vmatprep.subr.bf16.mxu1 %v3142_v2 }
0x35c3   :  { %1790 = vrot.lane.b32.xlu0 %v3480_v38, %s3146_s13  ;;  %v42_v38 = vld [vmem:[%s3607_s5 + $0x10] sm:$0xff] }
0x35c4   :  { %v2972_v28 = vpack.c.bf16 %v43_v26, %v42_v38 }
0x35c6   :  { %2973 = vmatpush3.bf16.msra.mxu1 %v2972_v28 }
0x35c7   :  { %2117 = vrot.lane.b32.xlu0 %v2115_v43, %s3146_s13 }
0x3629   :  { %v2329_v20 = vpop.permute.xlu0 %2328 }
0x362a   :  { %v2331_v21 = vadd.f32 %v2329_v20, %v2321_v19 }
0x362c   :  { %3140 = vtanh.f32 %v2331_v21 }
0x362d   :  { %v1239_v31 = vpop.permute.xlu0 %1238 }
0x362e   :  { %1242 = vst.msk [vmem:[#allocation2] sm:$0xc] %vm1241_vm5, %v1239_v31 }
0x3631   :  { %v1463_v27 = vpop.permute.xlu0 %1462 }
0x3632   :  { %1466 = vst.msk [vmem:[#allocation2] sm:$0xc0] %vm1465_vm6, %v1463_v27 }
0x3635   :  { %v1791_v29 = vpop.permute.xlu0 %1790 }
0x3636   :  { %v3141_v30 = vpop.eup %3140  ;;  %1793 = vst.msk [vmem:[#allocation2 + $0x8] sm:$0x30] %vm1353_vm7, %v1791_v29 }
0x3637   :  { %2334 = vrot.lane.b32.xlu1 %v3141_v30, %s3145_s12 }
0x3639   :  { %v2118_v2 = vpop.permute.xlu0 %2117 }
0x363a   :  { %2120 = vst.msk [vmem:[#allocation2 + $0x10] sm:$0xc] %vm1241_vm5, %v2118_v2 }
0x363b   :  { %1350 = vrot.lane.b32.xlu1 %v3415_v3, %s3146_s13 }
0x363f   :  { %1679 = vrot.lane.b32.xlu1 %v3465_v12, %s3146_s13 }
0x3643   :  { %1901 = vrot.lane.b32.xlu1 %v3498_v58, %s3146_s13 }
0x3647   :  { %2228 = vrot.lane.b32.xlu1 %v2226_v63, %s3146_s13 }
0x36a9   :  { %v2335_v32 = vpop.permute.xlu1 %2334 }
0x36aa   :  { %v2337_v22 = vmul.f32 %v3139_v15, %v2335_v32 }
0x36ac   :  { %2339 = vrot.lane.b32.xlu0 %v2337_v22, %s3146_s13 }
0x36ad   :  { %v1351_v33 = vpop.permute.xlu1 %1350 }
0x36ae   :  { %1354 = vst.msk [vmem:[#allocation2] sm:$0x30] %vm1353_vm7, %v1351_v33 }
0x36b1   :  { %v1680_v34 = vpop.permute.xlu1 %1679 }
0x36b2   :  { %1682 = vst.msk [vmem:[#allocation2 + $0x8] sm:$0xc] %vm1241_vm5, %v1680_v34 }
0x36b5   :  { %v1902_v35 = vpop.permute.xlu1 %1901  ;;  %v2343_v3 = vld [vmem:[#allocation2] sm:$0xff] }
0x36b6   :  { %1904 = vst.msk [vmem:[#allocation2 + $0x8] sm:$0xc0] %vm1465_vm6, %v1902_v35  ;;  %2840 = vmatmul.mubr.msk.f32.vlgmr.msra.gmra.mrb[18].mxu1 %vm181_vm3, %v2343_v3 }
0x36b7   :  { %2842 = vmatprep.mubr.msk.f32.mxu1 %vm3143_vm2, %v3144_v9 }
0x36b9   :  { %v2229_v12 = vpop.permute.xlu1 %2228 }
0x36ba   :  { %2231 = vst.msk [vmem:[#allocation2 + $0x10] sm:$0x30] %vm1353_vm7, %v2229_v12 }
0x36bd   :  { %v2344_v58 = vld [vmem:[#allocation2 + $0x8] sm:$0xff] }
0x36be   :  { %2843 = vmatmul.mubr.msk.f32.gmra.mrb[20].mxu1 %vm181_vm3, %v2344_v58 }
0x36bf   :  { %2845 = vmatprep.mubr.msk.f32.mxu1 %vm3143_vm2, %v3144_v9 }
0x371e   :  { %v2340_v24 = vpop.permute.xlu0 %2339 }
0x371f   :  { %2342 = vst.msk [vmem:[#allocation2 + $0x10] sm:$0xc0] %vm1465_vm6, %v2340_v24 }
0x3726   :  { %v2345_v37 = vld [vmem:[#allocation2 + $0x10] sm:$0xff] }
0x3727   :  { %2846 = vmatmul.mubr.msk.f32.gmra.mrb[22].mxu1 %vm181_vm3, %v2345_v37 }
0x3789   :  { %v2425_v40 = vpop.f32.mrb[18].mxu1 }
0x378a   :  { %v2426_v41 = vadd.f32 %v2492_v39, %v2425_v40  ;;  %v2841_v42 = vpop.f32.mrb[19].mxu1 }
0x378c   :  { %2439 = vst.msk [vmem:[%s3608_s6] sm:$0xff] %vm51_vm1, %v2426_v41 }
0x3791   :  { %v2430_v43 = vpop.f32.mrb[20].mxu1 }
0x3792   :  { %v2431_v9 = vadd.f32 %v2492_v39, %v2430_v43  ;;  %v2844_v44 = vpop.f32.mrb[21].mxu1 }
0x3794   :  { %2440 = vst.msk [vmem:[%s3608_s6 + $0x8] sm:$0xff] %vm51_vm1, %v2431_v9 }
0x37fa   :  { %v2435_v45 = vpop.f32.mrb[22].mxu1 }
0x37fb   :  { %v2436_v13 = vadd.f32 %v2492_v39, %v2435_v45  ;;  %v2847_v46 = vpop.f32.mrb[23].mxu1 }
0x37fd   :  { %2441 = vst.msk [vmem:[%s3608_s6 + $0x10] sm:$0xff] %vm51_vm1, %v2436_v13 }

</bundles_post_ra>
